<compile_context>
chip_gen: v6e
topology: v6e:2x2x1
jax: 0.10.0
libtpu: 0.0.40
codegen_flags: <defaults>
</compile_context>

<pallas_src>
import functools
import math

import jax
import jax.numpy as jnp
from jax.experimental import pallas as pl
from jax.experimental.pallas import tpu as pltpu


# ---- constants from the reference module -----------------------------------
MAX_CHANNELS = 768 // 4      # 192
WIDTH_SCALE = 2
DEPTH_SCALE = 1

_PAD_L = 8                   # left margin of the padded VMEM scratch -> 8-aligned interior store


def get_channels(x):
    limit = min(x, MAX_CHANNELS) * WIDTH_SCALE
    return int(math.ceil(limit / 8) * 8)


def fold_bn(gamma, beta, mean, var, eps=1e-5):
    scale = gamma / jnp.sqrt(var + eps)
    return scale, beta - mean * scale


def _silu(z):
    return z * jax.nn.sigmoid(z)


# ---------------------------------------------------------------------------
# In-kernel helper: 3x3 stride-1 'same' conv on a flattened (Ho*Wo, Cin) tile.
# pad_ref is a zero-bordered VMEM scratch (Ho+2, Wo+2*_PAD_L, Cin); the interior
# lives at rows [1, Ho+1) and (8-aligned) columns [_PAD_L, _PAD_L+Wo).
# w_taps is a (9, Cin, Cout) value; tap t = 3*di + dj.
# ---------------------------------------------------------------------------
def _conv3x3_same(pad_ref, x2d, w_taps, Ho, Wo, C):
    pad_ref[1:Ho + 1, _PAD_L:_PAD_L + Wo, :] = x2d.reshape(Ho, Wo, C)
    acc = None
    for di in range(3):
        for dj in range(3):
            xs = pad_ref[di:di + Ho, _PAD_L - 1 + dj:_PAD_L - 1 + dj + Wo, :]
            contrib = jnp.dot(xs.reshape(Ho * Wo, C), w_taps[3 * di + dj],
                              preferred_element_type=jnp.float32)
            acc = contrib if acc is None else acc + contrib
    return acc


# ---------------------------------------------------------------------------
# Fused layer kernel: one batch element per grid step.
# ---------------------------------------------------------------------------
def _layer_kernel(xp_ref, w0_ref, s0_ref, b0_ref,
                  w1a_ref, s1a_ref, b1a_ref,
                  w1b_ref, s1b_ref, b1b_ref,
                  wb1_ref, sb1_ref, bb1_ref,
                  wb2_ref, sb2_ref, bb2_ref,
                  w2a_ref, w2b_ref, w2m_ref, s2_ref, b2_ref,
                  o_ref, pad_ref, *, Ho, Wo, n_bottleneck):
    f32 = jnp.float32

    # Zero the padded scratch once per image; later stores only touch the interior,
    # so the borders stay zero for every 3x3 conv in this grid step.
    pad_ref[...] = jnp.zeros(pad_ref.shape, f32)

    # ---- stem Conv(k=3, s=2, p=1) + BN + SiLU as a patch matmul -------------
    z = jnp.dot(xp_ref[...], w0_ref[...], preferred_element_type=f32)
    y_stem = _silu(z * s0_ref[...] + b0_ref[...])                     # (HW, Cn)

    # ---- C2f.cv1 (1x1) + BN + SiLU, produced directly as the two chunks -----
    y0 = _silu(jnp.dot(y_stem, w1a_ref[...], preferred_element_type=f32)
               * s1a_ref[...] + b1a_ref[...])                         # (HW, c)
    y1 = _silu(jnp.dot(y_stem, w1b_ref[...], preferred_element_type=f32)
               * s1b_ref[...] + b1b_ref[...])                         # (HW, c)

    # ---- C2f.cv2 accumulated on the fly: concat is never materialized -------
    z2 = jnp.dot(y0, w2a_ref[...], preferred_element_type=f32)
    z2 = z2 + jnp.dot(y1, w2b_ref[...], preferred_element_type=f32)

    # ---- bottleneck chain (shortcut=False -> no residual add) ---------------
    cur = y1
    for i in range(n_bottleneck):
        a = _conv3x3_same(pad_ref, cur, wb1_ref[i], Ho, Wo, cur.shape[-1])
        a = _silu(a * sb1_ref[i] + bb1_ref[i])
        a = _conv3x3_same(pad_ref, a, wb2_ref[i], Ho, Wo, a.shape[-1])
        cur = _silu(a * sb2_ref[i] + bb2_ref[i])
        z2 = z2 + jnp.dot(cur, w2m_ref[i], preferred_element_type=f32)

    out = _silu(z2 * s2_ref[...] + b2_ref[...])                       # (HW, Cn)
    o_ref[...] = out.astype(o_ref.dtype)


# ---------------------------------------------------------------------------
# Host wrapper: NCHW in -> NCHW out (matches the PyTorch module).
# ---------------------------------------------------------------------------
def conv_bottleneck_layer_forward(x_nchw, kp):
    N, Cin, H, W = x_nchw.shape
    Ho = (H + 2 - 3) // 2 + 1
    Wo = (W + 2 - 3) // 2 + 1
    HW = Ho * Wo
    K0 = kp["w0"].shape[0]               # 9 * Cin
    Cn = kp["w0"].shape[1]
    c = kp["w1a"].shape[1]
    n_b = kp["w2m"].shape[0]

    # Stem stride-2 patch extraction (im2col) on the small-channel input.
    # This is the only host-side glue; XLA fuses the pad/slice/stack into one op.
    xpad = jnp.pad(x_nchw, ((0, 0), (0, 0), (1, 1), (1, 1)))
    cols = [xpad[:, :, di:di + 2 * Ho:2, dj:dj + 2 * Wo:2]            # (N, Cin, Ho, Wo)
            for di in range(3) for dj in range(3)]
    patches = jnp.stack(cols, axis=1)                                 # (N, 9, Cin, Ho, Wo)
    patches = jnp.transpose(patches, (0, 3, 4, 1, 2)).reshape(N, HW, K0)

    kernel = functools.partial(_layer_kernel, Ho=Ho, Wo=Wo, n_bottleneck=n_b)

    def bcast(shape):   # weight blocks: whole array, resident across grid steps
        return pl.BlockSpec(shape, lambda nb, _s=len(shape): (0,) * _s)

    in_specs = [
        pl.BlockSpec((None, HW, K0), lambda nb: (nb, 0, 0)),          # stem patches
        bcast((K0, Cn)), bcast((1, Cn)), bcast((1, Cn)),              # w0, s0, b0
        bcast((Cn, c)), bcast((1, c)), bcast((1, c)),                 # w1a, s1a, b1a
        bcast((Cn, c)), bcast((1, c)), bcast((1, c)),                 # w1b, s1b, b1b
        bcast((n_b, 9, c, c)), bcast((n_b, 1, c)), bcast((n_b, 1, c)),  # wb1, sb1, bb1
        bcast((n_b, 9, c, c)), bcast((n_b, 1, c)), bcast((n_b, 1, c)),  # wb2, sb2, bb2
        bcast((c, Cn)), bcast((c, Cn)), bcast((n_b, c, Cn)),          # w2a, w2b, w2m
        bcast((1, Cn)), bcast((1, Cn)),                               # s2, b2
    ]

    out2d = pl.pallas_call(
        kernel,
        out_shape=jax.ShapeDtypeStruct((N, HW, Cn), x_nchw.dtype),
        grid_spec=pltpu.PrefetchScalarGridSpec(
            num_scalar_prefetch=0,
            grid=(N,),
            in_specs=in_specs,
            out_specs=pl.BlockSpec((None, HW, Cn), lambda nb: (nb, 0, 0)),
            scratch_shapes=[pltpu.VMEM((Ho + 2, Wo + 2 * _PAD_L, c), jnp.float32)],
        ),
        compiler_params=pltpu.CompilerParams(
            dimension_semantics=("parallel",),
            vmem_limit_bytes=48 * 1024 * 1024,
        ),
    )(patches,
      kp["w0"], kp["s0"], kp["b0"],
      kp["w1a"], kp["s1a"], kp["b1a"],
      kp["w1b"], kp["s1b"], kp["b1b"],
      kp["wb1"], kp["sb1"], kp["bb1"],
      kp["wb2"], kp["sb2"], kp["bb2"],
      kp["w2a"], kp["w2b"], kp["w2m"], kp["s2"], kp["b2"])

    return jnp.transpose(out2d.reshape(N, Ho, Wo, Cn), (0, 3, 1, 2))  # back to NCHW


# ---------------------------------------------------------------------------
# Parameter construction (PyTorch layout) + conversion to kernel layout.
# ---------------------------------------------------------------------------
def make_torch_params(key, cin, cn_req, n_b):
    cn = get_channels(cn_req)
    c = cn // 2
    keys = iter(jax.random.split(key, 64))

    def conv_w(shape):
        return 0.1 * jax.random.normal(next(keys), shape, jnp.float32)

    def bn(cdim):
        g = 1.0 + 0.1 * jax.random.normal(next(keys), (cdim,), jnp.float32)
        b = 0.1 * jax.random.normal(next(keys), (cdim,), jnp.float32)
        m = 0.1 * jax.random.normal(next(keys), (cdim,), jnp.float32)
        v = 1.0 + 0.1 * jax.random.uniform(next(keys), (cdim,), jnp.float32)
        return fold_bn(g, b, m, v)

    p = {"cn": cn, "c": c, "n": n_b}
    p["w_stem"] = conv_w((cn, cin, 3, 3))
    p["s_stem"], p["b_stem"] = bn(cn)
    p["w_cv1"] = conv_w((2 * c, cn, 1, 1))
    p["s_cv1"], p["b_cv1"] = bn(2 * c)
    p["wb1"], p["sb1"], p["bb1"] = [], [], []
    p["wb2"], p["sb2"], p["bb2"] = [], [], []
    for _ in range(n_b):
        p["wb1"].append(conv_w((c, c, 3, 3)))
        s, b = bn(c); p["sb1"].append(s); p["bb1"].append(b)
        p["wb2"].append(conv_w((c, c, 3, 3)))
        s, b = bn(c); p["sb2"].append(s); p["bb2"].append(b)
    p["w_cv2"] = conv_w((cn, (2 + n_b) * c, 1, 1))
    p["s_cv2"], p["b_cv2"] = bn(cn)
    return p


def to_kernel_params(p):
    cn, c, n_b = p["cn"], p["c"], p["n"]
    kp = {}
    # stem: (Cn, Cin, 3, 3) -> (9*Cin, Cn), row index = tap*Cin + ci (matches patches)
    kp["w0"] = jnp.transpose(p["w_stem"], (2, 3, 1, 0)).reshape(-1, cn)
    kp["s0"] = p["s_stem"].reshape(1, cn)
    kp["b0"] = p["b_stem"].reshape(1, cn)
    # cv1: (2c, Cn, 1, 1) -> (Cn, 2c), split into the two chunk halves
    w1 = jnp.transpose(p["w_cv1"][:, :, 0, 0], (1, 0))
    kp["w1a"], kp["w1b"] = w1[:, :c], w1[:, c:]
    kp["s1a"] = p["s_cv1"][:c].reshape(1, c); kp["b1a"] = p["b_cv1"][:c].reshape(1, c)
    kp["s1b"] = p["s_cv1"][c:].reshape(1, c); kp["b1b"] = p["b_cv1"][c:].reshape(1, c)

    def conv3_to_taps(w):  # (Cout, Cin, 3, 3) -> (9, Cin, Cout)
        return jnp.transpose(w, (2, 3, 1, 0)).reshape(9, w.shape[1], w.shape[0])

    kp["wb1"] = jnp.stack([conv3_to_taps(w) for w in p["wb1"]])
    kp["sb1"] = jnp.stack([s.reshape(1, c) for s in p["sb1"]])
    kp["bb1"] = jnp.stack([b.reshape(1, c) for b in p["bb1"]])
    kp["wb2"] = jnp.stack([conv3_to_taps(w) for w in p["wb2"]])
    kp["sb2"] = jnp.stack([s.reshape(1, c) for s in p["sb2"]])
    kp["bb2"] = jnp.stack([b.reshape(1, c) for b in p["bb2"]])
    # cv2: (Cn, (2+n)c, 1, 1) -> ((2+n)c, Cn), split per concat source
    w2 = jnp.transpose(p["w_cv2"][:, :, 0, 0], (1, 0))
    kp["w2a"] = w2[:c]
    kp["w2b"] = w2[c:2 * c]
    kp["w2m"] = jnp.stack([w2[2 * c + i * c: 2 * c + (i + 1) * c] for i in range(n_b)])
    kp["s2"] = p["s_cv2"].reshape(1, cn)
    kp["b2"] = p["b_cv2"].reshape(1, cn)
    return kp


# ---------------------------------------------------------------------------
# Pure-JAX reference (lax.conv) of the PyTorch module for a correctness check.
# ---------------------------------------------------------------------------
def reference_forward(x, p):
    def conv_bn_silu(x, w, s, b, stride, pad):
        y = jax.lax.conv_general_dilated(
            x, w, window_strides=(stride, stride),
            padding=((pad, pad), (pad, pad)),
            dimension_numbers=("NCHW", "OIHW", "NCHW"))
        y = y * s[None, :, None, None] + b[None, :, None, None]
        return y * jax.nn.sigmoid(y)

    c, n_b = p["c"], p["n"]
    y = conv_bn_silu(x, p["w_stem"], p["s_stem"], p["b_stem"], 2, 1)
    y12 = conv_bn_silu(y, p["w_cv1"], p["s_cv1"], p["b_cv1"], 1, 0)
    ys = [y12[:, :c], y12[:, c:]]
    for i in range(n_b):
        a = conv_bn_silu(ys[-1], p["wb1"][i], p["sb1"][i], p["bb1"][i], 1, 1)
        ys.append(conv_bn_silu(a, p["wb2"][i], p["sb2"][i], p["bb2"][i], 1, 1))
    cat = jnp.concatenate(ys, axis=1)
    return conv_bn_silu(cat, p["w_cv2"], p["s_cv2"], p["b_cv2"], 1, 0)


if __name__ == "__main__":
    # Small shapes consistent with the module: ConvBottlenecLayer with li.cn=4,
    # cn=8 (-> getChannels(8)=16 output channels, c=8), n=1 bottleneck.
    N, CIN, H, W = 2, 4, 16, 16
    CN_REQ, NB = 8, DEPTH_SCALE * 1

    key = jax.random.PRNGKey(0)
    kx, kparams = jax.random.split(key)
    x = jax.random.normal(kx, (N, CIN, H, W), jnp.float32)

    torch_params = make_torch_params(kparams, CIN, CN_REQ, NB)
    kp = to_kernel_params(torch_params)

    fwd = jax.jit(conv_bottleneck_layer_forward)
    out = jax.block_until_ready(fwd(x, kp))

    cn = torch_params["cn"]
    assert out.shape == (N, cn, H // 2, W // 2), out.shape
    assert out.dtype == jnp.float32

    ref = jax.block_until_ready(reference_forward(x, torch_params))
    err = float(jnp.max(jnp.abs(out - ref)))
    assert err < 2e-2, f"kernel/reference mismatch: max abs err = {err}"

    print("KERNEL_OK")
</pallas_src>

<mosaic_0001>
module attributes {stable_mosaic.version = 11 : i64} {
  func.func @_layer_kernel(%arg0: i32, %arg1: memref<1x64x36xf32, #tpu.memory_space<vmem>>, %arg2: memref<36x16xf32, #tpu.memory_space<vmem>>, %arg3: memref<1x16xf32, #tpu.memory_space<vmem>>, %arg4: memref<1x16xf32, #tpu.memory_space<vmem>>, %arg5: memref<16x8xf32, #tpu.memory_space<vmem>>, %arg6: memref<1x8xf32, #tpu.memory_space<vmem>>, %arg7: memref<1x8xf32, #tpu.memory_space<vmem>>, %arg8: memref<16x8xf32, #tpu.memory_space<vmem>>, %arg9: memref<1x8xf32, #tpu.memory_space<vmem>>, %arg10: memref<1x8xf32, #tpu.memory_space<vmem>>, %arg11: memref<1x9x8x8xf32, #tpu.memory_space<vmem>>, %arg12: memref<1x1x8xf32, #tpu.memory_space<vmem>>, %arg13: memref<1x1x8xf32, #tpu.memory_space<vmem>>, %arg14: memref<1x9x8x8xf32, #tpu.memory_space<vmem>>, %arg15: memref<1x1x8xf32, #tpu.memory_space<vmem>>, %arg16: memref<1x1x8xf32, #tpu.memory_space<vmem>>, %arg17: memref<8x16xf32, #tpu.memory_space<vmem>>, %arg18: memref<8x16xf32, #tpu.memory_space<vmem>>, %arg19: memref<1x8x16xf32, #tpu.memory_space<vmem>>, %arg20: memref<1x16xf32, #tpu.memory_space<vmem>>, %arg21: memref<1x16xf32, #tpu.memory_space<vmem>>, %arg22: memref<1x64x16xf32, #tpu.memory_space<vmem>>, %arg23: memref<10x24x8xf32, #tpu.memory_space<vmem>>) attributes {dimension_semantics = [#tpu.dimension_semantics<parallel>], iteration_bounds = array<i64: 2>, scalar_prefetch = 0 : i64, scratch_operands = 1 : i64, tpu.core_type = #tpu.core_type<tc>, window_params = [{transform_indices = @transform_0, window_bounds = array<i64: 1, 64, 36>}, {pipeline_mode = #tpu.pipeline_mode<synchronous>, transform_indices = @transform_1, window_bounds = array<i64: 36, 16>}, {pipeline_mode = #tpu.pipeline_mode<synchronous>, transform_indices = @transform_2, window_bounds = array<i64: 1, 16>}, {pipeline_mode = #tpu.pipeline_mode<synchronous>, transform_indices = @transform_3, window_bounds = array<i64: 1, 16>}, {pipeline_mode = #tpu.pipeline_mode<synchronous>, transform_indices = @transform_4, window_bounds = array<i64: 16, 8>}, {pipeline_mode = #tpu.pipeline_mode<synchronous>, transform_indices = @transform_5, window_bounds = array<i64: 1, 8>}, {pipeline_mode = #tpu.pipeline_mode<synchronous>, transform_indices = @transform_6, window_bounds = array<i64: 1, 8>}, {pipeline_mode = #tpu.pipeline_mode<synchronous>, transform_indices = @transform_7, window_bounds = array<i64: 16, 8>}, {pipeline_mode = #tpu.pipeline_mode<synchronous>, transform_indices = @transform_8, window_bounds = array<i64: 1, 8>}, {pipeline_mode = #tpu.pipeline_mode<synchronous>, transform_indices = @transform_9, window_bounds = array<i64: 1, 8>}, {pipeline_mode = #tpu.pipeline_mode<synchronous>, transform_indices = @transform_10, window_bounds = array<i64: 1, 9, 8, 8>}, {pipeline_mode = #tpu.pipeline_mode<synchronous>, transform_indices = @transform_11, window_bounds = array<i64: 1, 1, 8>}, {pipeline_mode = #tpu.pipeline_mode<synchronous>, transform_indices = @transform_12, window_bounds = array<i64: 1, 1, 8>}, {pipeline_mode = #tpu.pipeline_mode<synchronous>, transform_indices = @transform_13, window_bounds = array<i64: 1, 9, 8, 8>}, {pipeline_mode = #tpu.pipeline_mode<synchronous>, transform_indices = @transform_14, window_bounds = array<i64: 1, 1, 8>}, {pipeline_mode = #tpu.pipeline_mode<synchronous>, transform_indices = @transform_15, window_bounds = array<i64: 1, 1, 8>}, {pipeline_mode = #tpu.pipeline_mode<synchronous>, transform_indices = @transform_16, window_bounds = array<i64: 8, 16>}, {pipeline_mode = #tpu.pipeline_mode<synchronous>, transform_indices = @transform_17, window_bounds = array<i64: 8, 16>}, {pipeline_mode = #tpu.pipeline_mode<synchronous>, transform_indices = @transform_18, window_bounds = array<i64: 1, 8, 16>}, {pipeline_mode = #tpu.pipeline_mode<synchronous>, transform_indices = @transform_19, window_bounds = array<i64: 1, 16>}, {pipeline_mode = #tpu.pipeline_mode<synchronous>, transform_indices = @transform_20, window_bounds = array<i64: 1, 16>}, {transform_indices = @transform_21, window_bounds = array<i64: 1, 64, 16>}]} {
    %cst = arith.constant 0.000000e+00 : f32
    %0 = vector.broadcast %cst : f32 to vector<10x24x8xf32>
    %c0 = arith.constant 0 : index
    %c0_0 = arith.constant 0 : index
    %c0_1 = arith.constant 0 : index
    %1 = vector.load %arg23[%c0, %c0_0, %c0_1] : memref<10x24x8xf32, #tpu.memory_space<vmem>>, vector<10x24x8xf32>
    tpu.vector_store %arg23[%c0, %c0_0, %c0_1], %0 {strides = array<i32>} : memref<10x24x8xf32, #tpu.memory_space<vmem>>, vector<10x24x8xf32>,
    %c0_2 = arith.constant 0 : index
    %c0_3 = arith.constant 0 : index
    %c0_4 = arith.constant 0 : index
    %2 = vector.load %arg1[%c0_2, %c0_3, %c0_4] : memref<1x64x36xf32, #tpu.memory_space<vmem>>, vector<1x64x36xf32>
    %3 = vector.shape_cast %2 : vector<1x64x36xf32> to vector<64x36xf32>
    %c0_5 = arith.constant 0 : index
    %c0_6 = arith.constant 0 : index
    %4 = vector.load %arg2[%c0_5, %c0_6] : memref<36x16xf32, #tpu.memory_space<vmem>>, vector<36x16xf32>
    %cst_7 = arith.constant dense<0.000000e+00> : vector<64x16xf32>
    %5 = tpu.matmul %3, %4, %cst_7 {dimension_numbers = #tpu.dot_dimension_numbers<[1], [0], [0], [1], [0, 0, 1, 1], [], []>} : vector<64x36xf32>, vector<36x16xf32>, vector<64x16xf32> -> vector<64x16xf32>
    %c0_8 = arith.constant 0 : index
    %c0_9 = arith.constant 0 : index
    %6 = vector.load %arg3[%c0_8, %c0_9] : memref<1x16xf32, #tpu.memory_space<vmem>>, vector<1x16xf32>
    %7 = vector.broadcast %6 : vector<1x16xf32> to vector<64x16xf32>
    %8 = arith.mulf %5, %7 : vector<64x16xf32>
    %c0_10 = arith.constant 0 : index
    %c0_11 = arith.constant 0 : index
    %9 = vector.load %arg4[%c0_10, %c0_11] : memref<1x16xf32, #tpu.memory_space<vmem>>, vector<1x16xf32>
    %10 = vector.broadcast %9 : vector<1x16xf32> to vector<64x16xf32>
    %11 = arith.addf %8, %10 : vector<64x16xf32>
    %12 = arith.negf %11 : vector<64x16xf32>
    %13 = math.exp %12 : vector<64x16xf32>
    %cst_12 = arith.constant 1.000000e+00 : f32
    %14 = vector.broadcast %cst_12 : f32 to vector<64x16xf32>
    %15 = arith.addf %14, %13 : vector<64x16xf32>
    %16 = arith.divf %14, %15 : vector<64x16xf32>
    %17 = arith.mulf %11, %16 : vector<64x16xf32>
    %c0_13 = arith.constant 0 : index
    %c0_14 = arith.constant 0 : index
    %18 = vector.load %arg5[%c0_13, %c0_14] : memref<16x8xf32, #tpu.memory_space<vmem>>, vector<16x8xf32>
    %cst_15 = arith.constant dense<0.000000e+00> : vector<64x8xf32>
    %19 = tpu.matmul %17, %18, %cst_15 {dimension_numbers = #tpu.dot_dimension_numbers<[1], [0], [0], [1], [0, 0, 1, 1], [], []>} : vector<64x16xf32>, vector<16x8xf32>, vector<64x8xf32> -> vector<64x8xf32>
    %c0_16 = arith.constant 0 : index
    %c0_17 = arith.constant 0 : index
    %20 = vector.load %arg6[%c0_16, %c0_17] : memref<1x8xf32, #tpu.memory_space<vmem>>, vector<1x8xf32>
    %21 = vector.broadcast %20 : vector<1x8xf32> to vector<64x8xf32>
    %22 = arith.mulf %19, %21 : vector<64x8xf32>
    %c0_18 = arith.constant 0 : index
    %c0_19 = arith.constant 0 : index
    %23 = vector.load %arg7[%c0_18, %c0_19] : memref<1x8xf32, #tpu.memory_space<vmem>>, vector<1x8xf32>
    %24 = vector.broadcast %23 : vector<1x8xf32> to vector<64x8xf32>
    %25 = arith.addf %22, %24 : vector<64x8xf32>
    %26 = arith.negf %25 : vector<64x8xf32>
    %27 = math.exp %26 : vector<64x8xf32>
    %cst_20 = arith.constant 1.000000e+00 : f32
    %28 = vector.broadcast %cst_20 : f32 to vector<64x8xf32>
    %29 = arith.addf %28, %27 : vector<64x8xf32>
    %30 = arith.divf %28, %29 : vector<64x8xf32>
    %31 = arith.mulf %25, %30 : vector<64x8xf32>
    %c0_21 = arith.constant 0 : index
    %c0_22 = arith.constant 0 : index
    %32 = vector.load %arg8[%c0_21, %c0_22] : memref<16x8xf32, #tpu.memory_space<vmem>>, vector<16x8xf32>
    %cst_23 = arith.constant dense<0.000000e+00> : vector<64x8xf32>
    %33 = tpu.matmul %17, %32, %cst_23 {dimension_numbers = #tpu.dot_dimension_numbers<[1], [0], [0], [1], [0, 0, 1, 1], [], []>} : vector<64x16xf32>, vector<16x8xf32>, vector<64x8xf32> -> vector<64x8xf32>
    %c0_24 = arith.constant 0 : index
    %c0_25 = arith.constant 0 : index
    %34 = vector.load %arg9[%c0_24, %c0_25] : memref<1x8xf32, #tpu.memory_space<vmem>>, vector<1x8xf32>
    %35 = vector.broadcast %34 : vector<1x8xf32> to vector<64x8xf32>
    %36 = arith.mulf %33, %35 : vector<64x8xf32>
    %c0_26 = arith.constant 0 : index
    %c0_27 = arith.constant 0 : index
    %37 = vector.load %arg10[%c0_26, %c0_27] : memref<1x8xf32, #tpu.memory_space<vmem>>, vector<1x8xf32>
    %38 = vector.broadcast %37 : vector<1x8xf32> to vector<64x8xf32>
    %39 = arith.addf %36, %38 : vector<64x8xf32>
    %40 = arith.negf %39 : vector<64x8xf32>
    %41 = math.exp %40 : vector<64x8xf32>
    %cst_28 = arith.constant 1.000000e+00 : f32
    %42 = vector.broadcast %cst_28 : f32 to vector<64x8xf32>
    %43 = arith.addf %42, %41 : vector<64x8xf32>
    %44 = arith.divf %42, %43 : vector<64x8xf32>
    %45 = arith.mulf %39, %44 : vector<64x8xf32>
    %c0_29 = arith.constant 0 : index
    %c0_30 = arith.constant 0 : index
    %46 = vector.load %arg17[%c0_29, %c0_30] : memref<8x16xf32, #tpu.memory_space<vmem>>, vector<8x16xf32>
    %cst_31 = arith.constant dense<0.000000e+00> : vector<64x16xf32>
    %47 = tpu.matmul %31, %46, %cst_31 {dimension_numbers = #tpu.dot_dimension_numbers<[1], [0], [0], [1], [0, 0, 1, 1], [], []>} : vector<64x8xf32>, vector<8x16xf32>, vector<64x16xf32> -> vector<64x16xf32>
    %c0_32 = arith.constant 0 : index
    %c0_33 = arith.constant 0 : index
    %48 = vector.load %arg18[%c0_32, %c0_33] : memref<8x16xf32, #tpu.memory_space<vmem>>, vector<8x16xf32>
    %cst_34 = arith.constant dense<0.000000e+00> : vector<64x16xf32>
    %49 = tpu.matmul %45, %48, %cst_34 {dimension_numbers = #tpu.dot_dimension_numbers<[1], [0], [0], [1], [0, 0, 1, 1], [], []>} : vector<64x8xf32>, vector<8x16xf32>, vector<64x16xf32> -> vector<64x16xf32>
    %50 = arith.addf %47, %49 : vector<64x16xf32>
    %c0_35 = arith.constant 0 : index
    %c0_36 = arith.constant 0 : index
    %c0_37 = arith.constant 0 : index
    %c0_38 = arith.constant 0 : index
    %51 = vector.load %arg11[%c0_35, %c0_36, %c0_37, %c0_38] : memref<1x9x8x8xf32, #tpu.memory_space<vmem>>, vector<1x9x8x8xf32>
    %52 = vector.shape_cast %51 : vector<1x9x8x8xf32> to vector<9x8x8xf32>
    %53 = vector.shape_cast %45 : vector<64x8xf32> to vector<8x8x8xf32>
    %c1 = arith.constant 1 : index
    %c8 = arith.constant 8 : index
    %c0_39 = arith.constant 0 : index
    %54 = vector.load %arg23[%c1, %c8, %c0_39] : memref<10x24x8xf32, #tpu.memory_space<vmem>>, vector<8x8x8xf32>
    tpu.vector_store %arg23[%c1, %c8, %c0_39], %53 {strides = array<i32>} : memref<10x24x8xf32, #tpu.memory_space<vmem>>, vector<8x8x8xf32>,
    %c0_40 = arith.constant 0 : index
    %c7 = arith.constant 7 : index
    %c0_41 = arith.constant 0 : index
    %55 = vector.load %arg23[%c0_40, %c7, %c0_41] : memref<10x24x8xf32, #tpu.memory_space<vmem>>, vector<8x8x8xf32>
    %56 = vector.shape_cast %55 : vector<8x8x8xf32> to vector<64x8xf32>
    %57 = vector.extract_strided_slice %52 {offsets = [0, 0, 0], sizes = [1, 8, 8], strides = [1, 1, 1]} : vector<9x8x8xf32> to vector<1x8x8xf32>
    %58 = vector.shape_cast %57 : vector<1x8x8xf32> to vector<8x8xf32>
    %cst_42 = arith.constant dense<0.000000e+00> : vector<64x8xf32>
    %59 = tpu.matmul %56, %58, %cst_42 {dimension_numbers = #tpu.dot_dimension_numbers<[1], [0], [0], [1], [0, 0, 1, 1], [], []>} : vector<64x8xf32>, vector<8x8xf32>, vector<64x8xf32> -> vector<64x8xf32>
    %c0_43 = arith.constant 0 : index
    %c8_44 = arith.constant 8 : index
    %c0_45 = arith.constant 0 : index
    %60 = vector.load %arg23[%c0_43, %c8_44, %c0_45] : memref<10x24x8xf32, #tpu.memory_space<vmem>>, vector<8x8x8xf32>
    %61 = vector.shape_cast %60 : vector<8x8x8xf32> to vector<64x8xf32>
    %62 = vector.extract_strided_slice %52 {offsets = [1, 0, 0], sizes = [1, 8, 8], strides = [1, 1, 1]} : vector<9x8x8xf32> to vector<1x8x8xf32>
    %63 = vector.shape_cast %62 : vector<1x8x8xf32> to vector<8x8xf32>
    %cst_46 = arith.constant dense<0.000000e+00> : vector<64x8xf32>
    %64 = tpu.matmul %61, %63, %cst_46 {dimension_numbers = #tpu.dot_dimension_numbers<[1], [0], [0], [1], [0, 0, 1, 1], [], []>} : vector<64x8xf32>, vector<8x8xf32>, vector<64x8xf32> -> vector<64x8xf32>
    %65 = arith.addf %59, %64 : vector<64x8xf32>
    %c0_47 = arith.constant 0 : index
    %c9 = arith.constant 9 : index
    %c0_48 = arith.constant 0 : index
    %66 = vector.load %arg23[%c0_47, %c9, %c0_48] : memref<10x24x8xf32, #tpu.memory_space<vmem>>, vector<8x8x8xf32>
    %67 = vector.shape_cast %66 : vector<8x8x8xf32> to vector<64x8xf32>
    %68 = vector.extract_strided_slice %52 {offsets = [2, 0, 0], sizes = [1, 8, 8], strides = [1, 1, 1]} : vector<9x8x8xf32> to vector<1x8x8xf32>
    %69 = vector.shape_cast %68 : vector<1x8x8xf32> to vector<8x8xf32>
    %cst_49 = arith.constant dense<0.000000e+00> : vector<64x8xf32>
    %70 = tpu.matmul %67, %69, %cst_49 {dimension_numbers = #tpu.dot_dimension_numbers<[1], [0], [0], [1], [0, 0, 1, 1], [], []>} : vector<64x8xf32>, vector<8x8xf32>, vector<64x8xf32> -> vector<64x8xf32>
    %71 = arith.addf %65, %70 : vector<64x8xf32>
    %c1_50 = arith.constant 1 : index
    %c7_51 = arith.constant 7 : index
    %c0_52 = arith.constant 0 : index
    %72 = vector.load %arg23[%c1_50, %c7_51, %c0_52] : memref<10x24x8xf32, #tpu.memory_space<vmem>>, vector<8x8x8xf32>
    %73 = vector.shape_cast %72 : vector<8x8x8xf32> to vector<64x8xf32>
    %74 = vector.extract_strided_slice %52 {offsets = [3, 0, 0], sizes = [1, 8, 8], strides = [1, 1, 1]} : vector<9x8x8xf32> to vector<1x8x8xf32>
    %75 = vector.shape_cast %74 : vector<1x8x8xf32> to vector<8x8xf32>
    %cst_53 = arith.constant dense<0.000000e+00> : vector<64x8xf32>
    %76 = tpu.matmul %73, %75, %cst_53 {dimension_numbers = #tpu.dot_dimension_numbers<[1], [0], [0], [1], [0, 0, 1, 1], [], []>} : vector<64x8xf32>, vector<8x8xf32>, vector<64x8xf32> -> vector<64x8xf32>
    %77 = arith.addf %71, %76 : vector<64x8xf32>
    %c1_54 = arith.constant 1 : index
    %c8_55 = arith.constant 8 : index
    %c0_56 = arith.constant 0 : index
    %78 = vector.load %arg23[%c1_54, %c8_55, %c0_56] : memref<10x24x8xf32, #tpu.memory_space<vmem>>, vector<8x8x8xf32>
    %79 = vector.shape_cast %78 : vector<8x8x8xf32> to vector<64x8xf32>
    %80 = vector.extract_strided_slice %52 {offsets = [4, 0, 0], sizes = [1, 8, 8], strides = [1, 1, 1]} : vector<9x8x8xf32> to vector<1x8x8xf32>
    %81 = vector.shape_cast %80 : vector<1x8x8xf32> to vector<8x8xf32>
    %cst_57 = arith.constant dense<0.000000e+00> : vector<64x8xf32>
    %82 = tpu.matmul %79, %81, %cst_57 {dimension_numbers = #tpu.dot_dimension_numbers<[1], [0], [0], [1], [0, 0, 1, 1], [], []>} : vector<64x8xf32>, vector<8x8xf32>, vector<64x8xf32> -> vector<64x8xf32>
    %83 = arith.addf %77, %82 : vector<64x8xf32>
    %c1_58 = arith.constant 1 : index
    %c9_59 = arith.constant 9 : index
    %c0_60 = arith.constant 0 : index
    %84 = vector.load %arg23[%c1_58, %c9_59, %c0_60] : memref<10x24x8xf32, #tpu.memory_space<vmem>>, vector<8x8x8xf32>
    %85 = vector.shape_cast %84 : vector<8x8x8xf32> to vector<64x8xf32>
    %86 = vector.extract_strided_slice %52 {offsets = [5, 0, 0], sizes = [1, 8, 8], strides = [1, 1, 1]} : vector<9x8x8xf32> to vector<1x8x8xf32>
    %87 = vector.shape_cast %86 : vector<1x8x8xf32> to vector<8x8xf32>
    %cst_61 = arith.constant dense<0.000000e+00> : vector<64x8xf32>
    %88 = tpu.matmul %85, %87, %cst_61 {dimension_numbers = #tpu.dot_dimension_numbers<[1], [0], [0], [1], [0, 0, 1, 1], [], []>} : vector<64x8xf32>, vector<8x8xf32>, vector<64x8xf32> -> vector<64x8xf32>
    %89 = arith.addf %83, %88 : vector<64x8xf32>
    %c2 = arith.constant 2 : index
    %c7_62 = arith.constant 7 : index
    %c0_63 = arith.constant 0 : index
    %90 = vector.load %arg23[%c2, %c7_62, %c0_63] : memref<10x24x8xf32, #tpu.memory_space<vmem>>, vector<8x8x8xf32>
    %91 = vector.shape_cast %90 : vector<8x8x8xf32> to vector<64x8xf32>
    %92 = vector.extract_strided_slice %52 {offsets = [6, 0, 0], sizes = [1, 8, 8], strides = [1, 1, 1]} : vector<9x8x8xf32> to vector<1x8x8xf32>
    %93 = vector.shape_cast %92 : vector<1x8x8xf32> to vector<8x8xf32>
    %cst_64 = arith.constant dense<0.000000e+00> : vector<64x8xf32>
    %94 = tpu.matmul %91, %93, %cst_64 {dimension_numbers = #tpu.dot_dimension_numbers<[1], [0], [0], [1], [0, 0, 1, 1], [], []>} : vector<64x8xf32>, vector<8x8xf32>, vector<64x8xf32> -> vector<64x8xf32>
    %95 = arith.addf %89, %94 : vector<64x8xf32>
    %c2_65 = arith.constant 2 : index
    %c8_66 = arith.constant 8 : index
    %c0_67 = arith.constant 0 : index
    %96 = vector.load %arg23[%c2_65, %c8_66, %c0_67] : memref<10x24x8xf32, #tpu.memory_space<vmem>>, vector<8x8x8xf32>
    %97 = vector.shape_cast %96 : vector<8x8x8xf32> to vector<64x8xf32>
    %98 = vector.extract_strided_slice %52 {offsets = [7, 0, 0], sizes = [1, 8, 8], strides = [1, 1, 1]} : vector<9x8x8xf32> to vector<1x8x8xf32>
    %99 = vector.shape_cast %98 : vector<1x8x8xf32> to vector<8x8xf32>
    %cst_68 = arith.constant dense<0.000000e+00> : vector<64x8xf32>
    %100 = tpu.matmul %97, %99, %cst_68 {dimension_numbers = #tpu.dot_dimension_numbers<[1], [0], [0], [1], [0, 0, 1, 1], [], []>} : vector<64x8xf32>, vector<8x8xf32>, vector<64x8xf32> -> vector<64x8xf32>
    %101 = arith.addf %95, %100 : vector<64x8xf32>
    %c2_69 = arith.constant 2 : index
    %c9_70 = arith.constant 9 : index
    %c0_71 = arith.constant 0 : index
    %102 = vector.load %arg23[%c2_69, %c9_70, %c0_71] : memref<10x24x8xf32, #tpu.memory_space<vmem>>, vector<8x8x8xf32>
    %103 = vector.shape_cast %102 : vector<8x8x8xf32> to vector<64x8xf32>
    %104 = vector.extract_strided_slice %52 {offsets = [8, 0, 0], sizes = [1, 8, 8], strides = [1, 1, 1]} : vector<9x8x8xf32> to vector<1x8x8xf32>
    %105 = vector.shape_cast %104 : vector<1x8x8xf32> to vector<8x8xf32>
    %cst_72 = arith.constant dense<0.000000e+00> : vector<64x8xf32>
    %106 = tpu.matmul %103, %105, %cst_72 {dimension_numbers = #tpu.dot_dimension_numbers<[1], [0], [0], [1], [0, 0, 1, 1], [], []>} : vector<64x8xf32>, vector<8x8xf32>, vector<64x8xf32> -> vector<64x8xf32>
    %107 = arith.addf %101, %106 : vector<64x8xf32>
    %c0_73 = arith.constant 0 : index
    %c0_74 = arith.constant 0 : index
    %c0_75 = arith.constant 0 : index
    %108 = vector.load %arg12[%c0_73, %c0_74, %c0_75] : memref<1x1x8xf32, #tpu.memory_space<vmem>>, vector<1x1x8xf32>
    %109 = vector.shape_cast %108 : vector<1x1x8xf32> to vector<1x8xf32>
    %110 = vector.broadcast %109 : vector<1x8xf32> to vector<64x8xf32>
    %111 = arith.mulf %107, %110 : vector<64x8xf32>
    %c0_76 = arith.constant 0 : index
    %c0_77 = arith.constant 0 : index
    %c0_78 = arith.constant 0 : index
    %112 = vector.load %arg13[%c0_76, %c0_77, %c0_78] : memref<1x1x8xf32, #tpu.memory_space<vmem>>, vector<1x1x8xf32>
    %113 = vector.shape_cast %112 : vector<1x1x8xf32> to vector<1x8xf32>
    %114 = vector.broadcast %113 : vector<1x8xf32> to vector<64x8xf32>
    %115 = arith.addf %111, %114 : vector<64x8xf32>
    %116 = arith.negf %115 : vector<64x8xf32>
    %117 = math.exp %116 : vector<64x8xf32>
    %cst_79 = arith.constant 1.000000e+00 : f32
    %118 = vector.broadcast %cst_79 : f32 to vector<64x8xf32>
    %119 = arith.addf %118, %117 : vector<64x8xf32>
    %120 = arith.divf %118, %119 : vector<64x8xf32>
    %121 = arith.mulf %115, %120 : vector<64x8xf32>
    %c0_80 = arith.constant 0 : index
    %c0_81 = arith.constant 0 : index
    %c0_82 = arith.constant 0 : index
    %c0_83 = arith.constant 0 : index
    %122 = vector.load %arg14[%c0_80, %c0_81, %c0_82, %c0_83] : memref<1x9x8x8xf32, #tpu.memory_space<vmem>>, vector<1x9x8x8xf32>
    %123 = vector.shape_cast %122 : vector<1x9x8x8xf32> to vector<9x8x8xf32>
    %124 = vector.shape_cast %121 : vector<64x8xf32> to vector<8x8x8xf32>
    %c1_84 = arith.constant 1 : index
    %c8_85 = arith.constant 8 : index
    %c0_86 = arith.constant 0 : index
    %125 = vector.load %arg23[%c1_84, %c8_85, %c0_86] : memref<10x24x8xf32, #tpu.memory_space<vmem>>, vector<8x8x8xf32>
    tpu.vector_store %arg23[%c1_84, %c8_85, %c0_86], %124 {strides = array<i32>} : memref<10x24x8xf32, #tpu.memory_space<vmem>>, vector<8x8x8xf32>,
    %c0_87 = arith.constant 0 : index
    %c7_88 = arith.constant 7 : index
    %c0_89 = arith.constant 0 : index
    %126 = vector.load %arg23[%c0_87, %c7_88, %c0_89] : memref<10x24x8xf32, #tpu.memory_space<vmem>>, vector<8x8x8xf32>
    %127 = vector.shape_cast %126 : vector<8x8x8xf32> to vector<64x8xf32>
    %128 = vector.extract_strided_slice %123 {offsets = [0, 0, 0], sizes = [1, 8, 8], strides = [1, 1, 1]} : vector<9x8x8xf32> to vector<1x8x8xf32>
    %129 = vector.shape_cast %128 : vector<1x8x8xf32> to vector<8x8xf32>
    %cst_90 = arith.constant dense<0.000000e+00> : vector<64x8xf32>
    %130 = tpu.matmul %127, %129, %cst_90 {dimension_numbers = #tpu.dot_dimension_numbers<[1], [0], [0], [1], [0, 0, 1, 1], [], []>} : vector<64x8xf32>, vector<8x8xf32>, vector<64x8xf32> -> vector<64x8xf32>
    %c0_91 = arith.constant 0 : index
    %c8_92 = arith.constant 8 : index
    %c0_93 = arith.constant 0 : index
    %131 = vector.load %arg23[%c0_91, %c8_92, %c0_93] : memref<10x24x8xf32, #tpu.memory_space<vmem>>, vector<8x8x8xf32>
    %132 = vector.shape_cast %131 : vector<8x8x8xf32> to vector<64x8xf32>
    %133 = vector.extract_strided_slice %123 {offsets = [1, 0, 0], sizes = [1, 8, 8], strides = [1, 1, 1]} : vector<9x8x8xf32> to vector<1x8x8xf32>
    %134 = vector.shape_cast %133 : vector<1x8x8xf32> to vector<8x8xf32>
    %cst_94 = arith.constant dense<0.000000e+00> : vector<64x8xf32>
    %135 = tpu.matmul %132, %134, %cst_94 {dimension_numbers = #tpu.dot_dimension_numbers<[1], [0], [0], [1], [0, 0, 1, 1], [], []>} : vector<64x8xf32>, vector<8x8xf32>, vector<64x8xf32> -> vector<64x8xf32>
    %136 = arith.addf %130, %135 : vector<64x8xf32>
    %c0_95 = arith.constant 0 : index
    %c9_96 = arith.constant 9 : index
    %c0_97 = arith.constant 0 : index
    %137 = vector.load %arg23[%c0_95, %c9_96, %c0_97] : memref<10x24x8xf32, #tpu.memory_space<vmem>>, vector<8x8x8xf32>
    %138 = vector.shape_cast %137 : vector<8x8x8xf32> to vector<64x8xf32>
    %139 = vector.extract_strided_slice %123 {offsets = [2, 0, 0], sizes = [1, 8, 8], strides = [1, 1, 1]} : vector<9x8x8xf32> to vector<1x8x8xf32>
    %140 = vector.shape_cast %139 : vector<1x8x8xf32> to vector<8x8xf32>
    %cst_98 = arith.constant dense<0.000000e+00> : vector<64x8xf32>
    %141 = tpu.matmul %138, %140, %cst_98 {dimension_numbers = #tpu.dot_dimension_numbers<[1], [0], [0], [1], [0, 0, 1, 1], [], []>} : vector<64x8xf32>, vector<8x8xf32>, vector<64x8xf32> -> vector<64x8xf32>
    %142 = arith.addf %136, %141 : vector<64x8xf32>
    %c1_99 = arith.constant 1 : index
    %c7_100 = arith.constant 7 : index
    %c0_101 = arith.constant 0 : index
    %143 = vector.load %arg23[%c1_99, %c7_100, %c0_101] : memref<10x24x8xf32, #tpu.memory_space<vmem>>, vector<8x8x8xf32>
    %144 = vector.shape_cast %143 : vector<8x8x8xf32> to vector<64x8xf32>
    %145 = vector.extract_strided_slice %123 {offsets = [3, 0, 0], sizes = [1, 8, 8], strides = [1, 1, 1]} : vector<9x8x8xf32> to vector<1x8x8xf32>
    %146 = vector.shape_cast %145 : vector<1x8x8xf32> to vector<8x8xf32>
    %cst_102 = arith.constant dense<0.000000e+00> : vector<64x8xf32>
    %147 = tpu.matmul %144, %146, %cst_102 {dimension_numbers = #tpu.dot_dimension_numbers<[1], [0], [0], [1], [0, 0, 1, 1], [], []>} : vector<64x8xf32>, vector<8x8xf32>, vector<64x8xf32> -> vector<64x8xf32>
    %148 = arith.addf %142, %147 : vector<64x8xf32>
    %c1_103 = arith.constant 1 : index
    %c8_104 = arith.constant 8 : index
    %c0_105 = arith.constant 0 : index
    %149 = vector.load %arg23[%c1_103, %c8_104, %c0_105] : memref<10x24x8xf32, #tpu.memory_space<vmem>>, vector<8x8x8xf32>
    %150 = vector.shape_cast %149 : vector<8x8x8xf32> to vector<64x8xf32>
    %151 = vector.extract_strided_slice %123 {offsets = [4, 0, 0], sizes = [1, 8, 8], strides = [1, 1, 1]} : vector<9x8x8xf32> to vector<1x8x8xf32>
    %152 = vector.shape_cast %151 : vector<1x8x8xf32> to vector<8x8xf32>
    %cst_106 = arith.constant dense<0.000000e+00> : vector<64x8xf32>
    %153 = tpu.matmul %150, %152, %cst_106 {dimension_numbers = #tpu.dot_dimension_numbers<[1], [0], [0], [1], [0, 0, 1, 1], [], []>} : vector<64x8xf32>, vector<8x8xf32>, vector<64x8xf32> -> vector<64x8xf32>
    %154 = arith.addf %148, %153 : vector<64x8xf32>
    %c1_107 = arith.constant 1 : index
    %c9_108 = arith.constant 9 : index
    %c0_109 = arith.constant 0 : index
    %155 = vector.load %arg23[%c1_107, %c9_108, %c0_109] : memref<10x24x8xf32, #tpu.memory_space<vmem>>, vector<8x8x8xf32>
    %156 = vector.shape_cast %155 : vector<8x8x8xf32> to vector<64x8xf32>
    %157 = vector.extract_strided_slice %123 {offsets = [5, 0, 0], sizes = [1, 8, 8], strides = [1, 1, 1]} : vector<9x8x8xf32> to vector<1x8x8xf32>
    %158 = vector.shape_cast %157 : vector<1x8x8xf32> to vector<8x8xf32>
    %cst_110 = arith.constant dense<0.000000e+00> : vector<64x8xf32>
    %159 = tpu.matmul %156, %158, %cst_110 {dimension_numbers = #tpu.dot_dimension_numbers<[1], [0], [0], [1], [0, 0, 1, 1], [], []>} : vector<64x8xf32>, vector<8x8xf32>, vector<64x8xf32> -> vector<64x8xf32>
    %160 = arith.addf %154, %159 : vector<64x8xf32>
    %c2_111 = arith.constant 2 : index
    %c7_112 = arith.constant 7 : index
    %c0_113 = arith.constant 0 : index
    %161 = vector.load %arg23[%c2_111, %c7_112, %c0_113] : memref<10x24x8xf32, #tpu.memory_space<vmem>>, vector<8x8x8xf32>
    %162 = vector.shape_cast %161 : vector<8x8x8xf32> to vector<64x8xf32>
    %163 = vector.extract_strided_slice %123 {offsets = [6, 0, 0], sizes = [1, 8, 8], strides = [1, 1, 1]} : vector<9x8x8xf32> to vector<1x8x8xf32>
    %164 = vector.shape_cast %163 : vector<1x8x8xf32> to vector<8x8xf32>
    %cst_114 = arith.constant dense<0.000000e+00> : vector<64x8xf32>
    %165 = tpu.matmul %162, %164, %cst_114 {dimension_numbers = #tpu.dot_dimension_numbers<[1], [0], [0], [1], [0, 0, 1, 1], [], []>} : vector<64x8xf32>, vector<8x8xf32>, vector<64x8xf32> -> vector<64x8xf32>
    %166 = arith.addf %160, %165 : vector<64x8xf32>
    %c2_115 = arith.constant 2 : index
    %c8_116 = arith.constant 8 : index
    %c0_117 = arith.constant 0 : index
    %167 = vector.load %arg23[%c2_115, %c8_116, %c0_117] : memref<10x24x8xf32, #tpu.memory_space<vmem>>, vector<8x8x8xf32>
    %168 = vector.shape_cast %167 : vector<8x8x8xf32> to vector<64x8xf32>
    %169 = vector.extract_strided_slice %123 {offsets = [7, 0, 0], sizes = [1, 8, 8], strides = [1, 1, 1]} : vector<9x8x8xf32> to vector<1x8x8xf32>
    %170 = vector.shape_cast %169 : vector<1x8x8xf32> to vector<8x8xf32>
    %cst_118 = arith.constant dense<0.000000e+00> : vector<64x8xf32>
    %171 = tpu.matmul %168, %170, %cst_118 {dimension_numbers = #tpu.dot_dimension_numbers<[1], [0], [0], [1], [0, 0, 1, 1], [], []>} : vector<64x8xf32>, vector<8x8xf32>, vector<64x8xf32> -> vector<64x8xf32>
    %172 = arith.addf %166, %171 : vector<64x8xf32>
    %c2_119 = arith.constant 2 : index
    %c9_120 = arith.constant 9 : index
    %c0_121 = arith.constant 0 : index
    %173 = vector.load %arg23[%c2_119, %c9_120, %c0_121] : memref<10x24x8xf32, #tpu.memory_space<vmem>>, vector<8x8x8xf32>
    %174 = vector.shape_cast %173 : vector<8x8x8xf32> to vector<64x8xf32>
    %175 = vector.extract_strided_slice %123 {offsets = [8, 0, 0], sizes = [1, 8, 8], strides = [1, 1, 1]} : vector<9x8x8xf32> to vector<1x8x8xf32>
    %176 = vector.shape_cast %175 : vector<1x8x8xf32> to vector<8x8xf32>
    %cst_122 = arith.constant dense<0.000000e+00> : vector<64x8xf32>
    %177 = tpu.matmul %174, %176, %cst_122 {dimension_numbers = #tpu.dot_dimension_numbers<[1], [0], [0], [1], [0, 0, 1, 1], [], []>} : vector<64x8xf32>, vector<8x8xf32>, vector<64x8xf32> -> vector<64x8xf32>
    %178 = arith.addf %172, %177 : vector<64x8xf32>
    %c0_123 = arith.constant 0 : index
    %c0_124 = arith.constant 0 : index
    %c0_125 = arith.constant 0 : index
    %179 = vector.load %arg15[%c0_123, %c0_124, %c0_125] : memref<1x1x8xf32, #tpu.memory_space<vmem>>, vector<1x1x8xf32>
    %180 = vector.shape_cast %179 : vector<1x1x8xf32> to vector<1x8xf32>
    %181 = vector.broadcast %180 : vector<1x8xf32> to vector<64x8xf32>
    %182 = arith.mulf %178, %181 : vector<64x8xf32>
    %c0_126 = arith.constant 0 : index
    %c0_127 = arith.constant 0 : index
    %c0_128 = arith.constant 0 : index
    %183 = vector.load %arg16[%c0_126, %c0_127, %c0_128] : memref<1x1x8xf32, #tpu.memory_space<vmem>>, vector<1x1x8xf32>
    %184 = vector.shape_cast %183 : vector<1x1x8xf32> to vector<1x8xf32>
    %185 = vector.broadcast %184 : vector<1x8xf32> to vector<64x8xf32>
    %186 = arith.addf %182, %185 : vector<64x8xf32>
    %187 = arith.negf %186 : vector<64x8xf32>
    %188 = math.exp %187 : vector<64x8xf32>
    %cst_129 = arith.constant 1.000000e+00 : f32
    %189 = vector.broadcast %cst_129 : f32 to vector<64x8xf32>
    %190 = arith.addf %189, %188 : vector<64x8xf32>
    %191 = arith.divf %189, %190 : vector<64x8xf32>
    %192 = arith.mulf %186, %191 : vector<64x8xf32>
    %c0_130 = arith.constant 0 : index
    %c0_131 = arith.constant 0 : index
    %c0_132 = arith.constant 0 : index
    %193 = vector.load %arg19[%c0_130, %c0_131, %c0_132] : memref<1x8x16xf32, #tpu.memory_space<vmem>>, vector<1x8x16xf32>
    %194 = vector.shape_cast %193 : vector<1x8x16xf32> to vector<8x16xf32>
    %cst_133 = arith.constant dense<0.000000e+00> : vector<64x16xf32>
    %195 = tpu.matmul %192, %194, %cst_133 {dimension_numbers = #tpu.dot_dimension_numbers<[1], [0], [0], [1], [0, 0, 1, 1], [], []>} : vector<64x8xf32>, vector<8x16xf32>, vector<64x16xf32> -> vector<64x16xf32>
    %196 = arith.addf %50, %195 : vector<64x16xf32>
    %c0_134 = arith.constant 0 : index
    %c0_135 = arith.constant 0 : index
    %197 = vector.load %arg20[%c0_134, %c0_135] : memref<1x16xf32, #tpu.memory_space<vmem>>, vector<1x16xf32>
    %198 = vector.broadcast %197 : vector<1x16xf32> to vector<64x16xf32>
    %199 = arith.mulf %196, %198 : vector<64x16xf32>
    %c0_136 = arith.constant 0 : index
    %c0_137 = arith.constant 0 : index
    %200 = vector.load %arg21[%c0_136, %c0_137] : memref<1x16xf32, #tpu.memory_space<vmem>>, vector<1x16xf32>
    %201 = vector.broadcast %200 : vector<1x16xf32> to vector<64x16xf32>
    %202 = arith.addf %199, %201 : vector<64x16xf32>
    %203 = arith.negf %202 : vector<64x16xf32>
    %204 = math.exp %203 : vector<64x16xf32>
    %cst_138 = arith.constant 1.000000e+00 : f32
    %205 = vector.broadcast %cst_138 : f32 to vector<64x16xf32>
    %206 = arith.addf %205, %204 : vector<64x16xf32>
    %207 = arith.divf %205, %206 : vector<64x16xf32>
    %208 = arith.mulf %202, %207 : vector<64x16xf32>
    %c0_139 = arith.constant 0 : index
    %c0_140 = arith.constant 0 : index
    %c0_141 = arith.constant 0 : index
    %209 = vector.load %arg22[%c0_139, %c0_140, %c0_141] : memref<1x64x16xf32, #tpu.memory_space<vmem>>, vector<1x64x16xf32>
    %210 = vector.shape_cast %209 : vector<1x64x16xf32> to vector<64x16xf32>
    %211 = vector.shape_cast %208 : vector<64x16xf32> to vector<1x64x16xf32>
    tpu.vector_store %arg22[%c0_139, %c0_140, %c0_141], %211 {strides = array<i32>} : memref<1x64x16xf32, #tpu.memory_space<vmem>>, vector<1x64x16xf32>,
    return
  }
  func.func @transform_0(%arg0: i32) -> (i32, i32, i32) {
    %c0_i32 = arith.constant 0 : i32
    %c0_i32_0 = arith.constant 0 : i32
    %c0_i32_1 = arith.constant 0 : i32
    return %arg0, %c0_i32, %c0_i32_0 : i32, i32, i32
  }
  func.func @transform_1(%arg0: i32) -> (i32, i32) {
    %c0_i32 = arith.constant 0 : i32
    %c0_i32_0 = arith.constant 0 : i32
    %c0_i32_1 = arith.constant 0 : i32
    return %c0_i32, %c0_i32_0 : i32, i32
  }
  func.func @transform_2(%arg0: i32) -> (i32, i32) {
    %c0_i32 = arith.constant 0 : i32
    %c0_i32_0 = arith.constant 0 : i32
    %c0_i32_1 = arith.constant 0 : i32
    return %c0_i32, %c0_i32_0 : i32, i32
  }
  func.func @transform_3(%arg0: i32) -> (i32, i32) {
    %c0_i32 = arith.constant 0 : i32
    %c0_i32_0 = arith.constant 0 : i32
    %c0_i32_1 = arith.constant 0 : i32
    return %c0_i32, %c0_i32_0 : i32, i32
  }
  func.func @transform_4(%arg0: i32) -> (i32, i32) {
    %c0_i32 = arith.constant 0 : i32
    %c0_i32_0 = arith.constant 0 : i32
    %c0_i32_1 = arith.constant 0 : i32
    return %c0_i32, %c0_i32_0 : i32, i32
  }
  func.func @transform_5(%arg0: i32) -> (i32, i32) {
    %c0_i32 = arith.constant 0 : i32
    %c0_i32_0 = arith.constant 0 : i32
    %c0_i32_1 = arith.constant 0 : i32
    return %c0_i32, %c0_i32_0 : i32, i32
  }
  func.func @transform_6(%arg0: i32) -> (i32, i32) {
    %c0_i32 = arith.constant 0 : i32
    %c0_i32_0 = arith.constant 0 : i32
    %c0_i32_1 = arith.constant 0 : i32
    return %c0_i32, %c0_i32_0 : i32, i32
  }
  func.func @transform_7(%arg0: i32) -> (i32, i32) {
    %c0_i32 = arith.constant 0 : i32
    %c0_i32_0 = arith.constant 0 : i32
    %c0_i32_1 = arith.constant 0 : i32
    return %c0_i32, %c0_i32_0 : i32, i32
  }
  func.func @transform_8(%arg0: i32) -> (i32, i32) {
    %c0_i32 = arith.constant 0 : i32
    %c0_i32_0 = arith.constant 0 : i32
    %c0_i32_1 = arith.constant 0 : i32
    return %c0_i32, %c0_i32_0 : i32, i32
  }
  func.func @transform_9(%arg0: i32) -> (i32, i32) {
    %c0_i32 = arith.constant 0 : i32
    %c0_i32_0 = arith.constant 0 : i32
    %c0_i32_1 = arith.constant 0 : i32
    return %c0_i32, %c0_i32_0 : i32, i32
  }
  func.func @transform_10(%arg0: i32) -> (i32, i32, i32, i32) {
    %c0_i32 = arith.constant 0 : i32
    %c0_i32_0 = arith.constant 0 : i32
    %c0_i32_1 = arith.constant 0 : i32
    %c0_i32_2 = arith.constant 0 : i32
    %c0_i32_3 = arith.constant 0 : i32
    return %c0_i32, %c0_i32_0, %c0_i32_1, %c0_i32_2 : i32, i32, i32, i32
  }
  func.func @transform_11(%arg0: i32) -> (i32, i32, i32) {
    %c0_i32 = arith.constant 0 : i32
    %c0_i32_0 = arith.constant 0 : i32
    %c0_i32_1 = arith.constant 0 : i32
    %c0_i32_2 = arith.constant 0 : i32
    return %c0_i32, %c0_i32_0, %c0_i32_1 : i32, i32, i32
  }
  func.func @transform_12(%arg0: i32) -> (i32, i32, i32) {
    %c0_i32 = arith.constant 0 : i32
    %c0_i32_0 = arith.constant 0 : i32
    %c0_i32_1 = arith.constant 0 : i32
    %c0_i32_2 = arith.constant 0 : i32
    return %c0_i32, %c0_i32_0, %c0_i32_1 : i32, i32, i32
  }
  func.func @transform_13(%arg0: i32) -> (i32, i32, i32, i32) {
    %c0_i32 = arith.constant 0 : i32
    %c0_i32_0 = arith.constant 0 : i32
    %c0_i32_1 = arith.constant 0 : i32
    %c0_i32_2 = arith.constant 0 : i32
    %c0_i32_3 = arith.constant 0 : i32
    return %c0_i32, %c0_i32_0, %c0_i32_1, %c0_i32_2 : i32, i32, i32, i32
  }
  func.func @transform_14(%arg0: i32) -> (i32, i32, i32) {
    %c0_i32 = arith.constant 0 : i32
    %c0_i32_0 = arith.constant 0 : i32
    %c0_i32_1 = arith.constant 0 : i32
    %c0_i32_2 = arith.constant 0 : i32
    return %c0_i32, %c0_i32_0, %c0_i32_1 : i32, i32, i32
  }
  func.func @transform_15(%arg0: i32) -> (i32, i32, i32) {
    %c0_i32 = arith.constant 0 : i32
    %c0_i32_0 = arith.constant 0 : i32
    %c0_i32_1 = arith.constant 0 : i32
    %c0_i32_2 = arith.constant 0 : i32
    return %c0_i32, %c0_i32_0, %c0_i32_1 : i32, i32, i32
  }
  func.func @transform_16(%arg0: i32) -> (i32, i32) {
    %c0_i32 = arith.constant 0 : i32
    %c0_i32_0 = arith.constant 0 : i32
    %c0_i32_1 = arith.constant 0 : i32
    return %c0_i32, %c0_i32_0 : i32, i32
  }
  func.func @transform_17(%arg0: i32) -> (i32, i32) {
    %c0_i32 = arith.constant 0 : i32
    %c0_i32_0 = arith.constant 0 : i32
    %c0_i32_1 = arith.constant 0 : i32
    return %c0_i32, %c0_i32_0 : i32, i32
  }
  func.func @transform_18(%arg0: i32) -> (i32, i32, i32) {
    %c0_i32 = arith.constant 0 : i32
    %c0_i32_0 = arith.constant 0 : i32
    %c0_i32_1 = arith.constant 0 : i32
    %c0_i32_2 = arith.constant 0 : i32
    return %c0_i32, %c0_i32_0, %c0_i32_1 : i32, i32, i32
  }
  func.func @transform_19(%arg0: i32) -> (i32, i32) {
    %c0_i32 = arith.constant 0 : i32
    %c0_i32_0 = arith.constant 0 : i32
    %c0_i32_1 = arith.constant 0 : i32
    return %c0_i32, %c0_i32_0 : i32, i32
  }
  func.func @transform_20(%arg0: i32) -> (i32, i32) {
    %c0_i32 = arith.constant 0 : i32
    %c0_i32_0 = arith.constant 0 : i32
    %c0_i32_1 = arith.constant 0 : i32
    return %c0_i32, %c0_i32_0 : i32, i32
  }
  func.func @transform_21(%arg0: i32) -> (i32, i32, i32) {
    %c0_i32 = arith.constant 0 : i32
    %c0_i32_0 = arith.constant 0 : i32
    %c0_i32_1 = arith.constant 0 : i32
    return %arg0, %c0_i32, %c0_i32_0 : i32, i32, i32
  }
}

</mosaic_0001>

<bundles_post_ra>
// kernel: conv_bottleneck_layer_forward.1
= control target key start
LH: loop header
LB: loop body
LE: loop exit
PB: predicated region body
PF: predicated region fallthrough
CT: control target
= control target key end

     0   :  { %s6738_s0 = inlined_call_operand.vmem [shape: f32[2,64,36], index: 0, kind: input, shape index: {}]   ;;  %s6739_s1 = inlined_call_operand.vmem [shape: f32[36,16], index: 1, kind: input, shape index: {}]   ;;  %s6740_s2 = inlined_call_operand.vmem [shape: f32[1,16], index: 2, kind: input, shape index: {}]   ;;  %s6741_s3 = inlined_call_operand.vmem [shape: f32[1,16], index: 3, kind: input, shape index: {}]   ;;  %s6742_s4 = inlined_call_operand.vmem [shape: f32[16,8], index: 4, kind: input, shape index: {}]   ;;  %s6743_s5 = inlined_call_operand.vmem [shape: f32[1,8], index: 5, kind: input, shape index: {}]   ;;  %s6744_s6 = inlined_call_operand.vmem [shape: f32[1,8], index: 6, kind: input, shape index: {}]   ;;  %s6745_s7 = inlined_call_operand.vmem [shape: f32[16,8], index: 7, kind: input, shape index: {}]   ;;  %s6746_s8 = inlined_call_operand.vmem [shape: f32[1,8], index: 8, kind: input, shape index: {}]   ;;  %s6747_s9 = inlined_call_operand.vmem [shape: f32[1,8], index: 9, kind: input, shape index: {}]   ;;  %s6748_s10 = inlined_call_operand.vmem [shape: f32[1,9,8,8], index: 10, kind: input, shape index: {}]   ;;  %s6749_s11 = inlined_call_operand.vmem [shape: f32[1,1,8], index: 11, kind: input, shape index: {}]   ;;  %s6750_s12 = inlined_call_operand.vmem [shape: f32[1,1,8], index: 12, kind: input, shape index: {}]   ;;  %s6751_s13 = inlined_call_operand.vmem [shape: f32[1,9,8,8], index: 13, kind: input, shape index: {}]   ;;  %s6752_s14 = inlined_call_operand.vmem [shape: f32[1,1,8], index: 14, kind: input, shape index: {}]   ;;  %s6753_s15 = inlined_call_operand.vmem [shape: f32[1,1,8], index: 15, kind: input, shape index: {}]   ;;  %s6754_s16 = inlined_call_operand.vmem [shape: f32[8,16], index: 16, kind: input, shape index: {}]   ;;  %s6755_s17 = inlined_call_operand.vmem [shape: f32[8,16], index: 17, kind: input, shape index: {}]   ;;  %s6756_s18 = inlined_call_operand.vmem [shape: f32[1,8,16], index: 18, kind: input, shape index: {}]   ;;  %s6757_s19 = inlined_call_operand.vmem [shape: f32[1,16], index: 19, kind: input, shape index: {}]   ;;  %s6758_s20 = inlined_call_operand.vmem [shape: f32[1,16], index: 20, kind: input, shape index: {}]   ;;  %s6759_s21 = inlined_call_operand.hbm [shape: f32[2,64,16], index: 21, kind: output, shape index: {}]  }
   0x1   :  { %6775 = sst [smem:[#allocation29_spill]] %s6738_s0 }
   0x2   :  { %6776 = sst [smem:[#allocation30_spill]] %s6739_s1 }
   0x3   :  { %6777 = sst [smem:[#allocation31_spill]] %s6740_s2 }
   0x4   :  { %6778 = sst [smem:[#allocation32_spill]] %s6741_s3 }
   0x5   :  { %6779 = sst [smem:[#allocation33_spill]] %s6742_s4 }
   0x6   :  { %6780 = sst [smem:[#allocation34_spill]] %s6743_s5 }
   0x7   :  { %6781 = sst [smem:[#allocation35_spill]] %s6744_s6 }
   0x8   :  { %6782 = sst [smem:[#allocation36_spill]] %s6745_s7 }
   0x9   :  { %6783 = sst [smem:[#allocation37_spill]] %s6759_s21 }
   0xa   :  { %26 = vsyncpa [#allocation4], 0 }
   0xb   :  { %28 = vsyncpa [#allocation4 + $0x1], 0  ;;  %s5931_s2 = smov 0   ;;  %s5933_s25 = smov 0  }
   0xc   :  { %s5935_s26 = smov 0   ;;  %s5937_s27 = smov 0  }
   0xd LB: > { %6784 = sst [smem:[#allocation6_spill]] %s5803_s2  ;;  %s5952_s3 = sadd.s32 4294967295, %s5815_s27   ;;  %s5815_s27 = sphi %s5937_s27, %s6845_s27   ;;  %s5811_s26 = sphi %s5935_s26, %s6850_s26   ;;  %s5807_s25 = sphi %s5933_s25, %s6849_s25   ;;  %s5803_s2 = sphi %s5931_s2, %s6848_s2  }
   0xe   : > { %6785 = sst [smem:[#allocation7_spill]] %s5811_s26  ;;  %s4684_s28 = sadd.s32 4294967294, %s5815_s27  }
   0xf   : > { %6786 = sst [smem:[#allocation8_spill]] %s5815_s27  ;;  %s5956_s29 = sadd.s32 1, %s5815_s27  }
  0x10   : > { %6787 = sst [smem:[#allocation9_spill]] %s5956_s29  ;;  %s487_s0 = sadd.s32 1, %s5811_s26 }
  0x11   : > { %s484_s4 = ssub.s32 %s5815_s27, %s5956_s29  ;;  %p497_p0 = scmp.ne.s32.totalorder %s5811_s26, %s5807_s25 }
  0x12   : > { %p485_p1 = scmp.eq.s32.totalorder %s484_s4, 0  ;;  %p498_p2 = scmp.eq.s32.totalorder %s5952_s3, 1 }
  0x13   : > { %p503_p3 = scmp.ne.s32.totalorder %s5807_s25, %s5803_s2  ;;  %p504_p4 = scmp.eq.s32.totalorder %s4684_s28, 1 }
  0x14   : > { %s5967_s30 = scalar_select %p485_p1, %s5811_s26, %s487_s0  }
  0x15   : > { %p5969_p5 = por %p498_p2, %p497_p0  ;;  %p5973_p6 = por %p504_p4, %p503_p3 }
  0x16   : > { %6788 = sst [smem:[#allocation10_spill]] %s5967_s30  ;;  %p4687_p7 = scmp.ge.s32.totalorder %s5815_s27, 1 }
  0x17   : > { %s6790_s22 = scalar_select %p5973_p6, 1, 0 }
  0x18   : > { %p590_p8 = scmp.lt.s32.totalorder %s5815_s27, 3 }
  0x19   : > { %6791 = sst [smem:[#allocation11_spill]] %s6790_s22 }
  0x1a   : > { %p591_p9 = pnand %p4687_p7, %p590_p8 }
  0x1c   : > { %594 = sbr.rel (%p591_p9) target bundleno = 1419 (0x58b), region = 104 }
  0x21   : > { %s6792_s24 = sld [smem:[#allocation30_spill]]  ;;  %vm724_vm0 = vcmask 1043456   ;;  %p650_p10 = scmp.lt.s32.totalorder %s5952_s3, 1  ;;  %vm699_vm1 = vcmask 293888   ;;  %vm921_vm2 = vcmask 130048   ;;  %vm655_vm3 = vcmask 64512  }
  0x22   : > { %s6793_s0 = sld [smem:[#allocation29_spill]]  ;;  %s4950_s22 = sshll.u32 %s5952_s3, 10 }
  0x23   : > { %s651_s26 = scalar_select %p650_p10, %s5952_s3, 1 }
  0x24   : > { %s6794_s27 = sld [smem:[#allocation33_spill]]  ;;  %s5818_s21 = smov [#allocation3]  }
  0x25   : > { %s4949_s1 = sshll.u32 %s651_s26, 6  ;;  %s6796_s7 = sld [smem:[#allocation36_spill]] }
  0x26   : > { %s6797_s28 = sld [smem:[#allocation31_spill]] }
  0x27   : > { %v698_v0 = vld [vmem:[%s6792_s24 + $0x20] sm:$0xf]  ;;  %v697_v1 = vld [vmem:[%s6792_s24 + $0x18] sm:$0xff]  ;;  %v696_v2 = vld [vmem:[%s6792_s24 + $0x10] sm:$0xff]  ;;  %s6798_s26 = sld [smem:[#allocation32_spill]] }
  0x28   : > { %5173 = vmatprep.subr.msk.mxu0 %vm724_vm0, %v698_v0  ;;  %v695_v3 = vld [vmem:[%s6792_s24 + $0x8] sm:$0xff]  ;;  %s654_s2 = scalar_lea.vmem %s6793_s0, %s4949_s1  ;;  %v694_v4 = vld [vmem:[%s6792_s24] sm:$0xff]  ;;  %s6799_s30 = sld [smem:[#allocation34_spill]] }
  0x29   : > { %5174 = vmatpush3.msk.msra.mxu0 %vm724_vm0, %v698_v0  ;;  %v686_v5 = vld [vmem:[%s654_s2] sm:$0xff]  ;;  %v687_v6 = vld [vmem:[%s654_s2 + $0x8] sm:$0xff]  ;;  %v688_v7 = vld [vmem:[%s654_s2 + $0x10] sm:$0xff]  ;;  %s6800_s6 = sld [smem:[#allocation35_spill]] }
  0x2a   : > { %5175 = vmatprep.subr.mxu0 %v697_v1  ;;  %5183 = vmatprep.mubr.msk.f32.mxu0 %vm699_vm1, %v686_v5  ;;  %v689_v8 = vld [vmem:[%s654_s2 + $0x18] sm:$0xff]  ;;  %v690_v9 = vld [vmem:[%s654_s2 + $0x20] sm:$0xff]  ;;  %v691_v10 = vld [vmem:[%s654_s2 + $0x28] sm:$0xff]  ;;  %s6795_s29 = smov %s6794_s27  ;;  %s6841_s1 = sld [smem:[#allocation37_spill]] }
  0x2b   : > { %5176 = vmatpush3.msra.mxu0 %v697_v1  ;;  %v692_v11 = vld [vmem:[%s654_s2 + $0x30] sm:$0xff]  ;;  %v693_v12 = vld [vmem:[%s654_s2 + $0x38] sm:$0xff]  ;;  %v920_v13 = vld [vmem:[%s6794_s27 + $0x8] sm:$0xff] }
  0x2c   : > { %5177 = vmatprep.subr.mxu0 %v696_v2  ;;  %5195 = vmatprep.subr.mxu1 %v920_v13  ;;  %v919_v14 = vld [vmem:[%s6795_s29] sm:$0xff]  ;;  %v6016_v15 = vld [vmem:[%s6796_s7 + $0x8] sm:$0xff] }
  0x2d   : > { %5178 = vmatpush3.msra.mxu0 %v696_v2  ;;  %5196 = vmatpush3.msra.mxu1 %v920_v13  ;;  %v4700_v16 = vld [vmem:[%s6797_s28] ss:$0 sm:$0xff] }
  0x2e   : > { %5179 = vmatprep.subr.mxu0 %v695_v3  ;;  %5197 = vmatprep.subr.mxu1 %v919_v14  ;;  %v4701_v18 = vld [vmem:[%s6798_s26] ss:$0 sm:$0xff]  ;;  %s647_s26 = sand.u32 1, %s5807_s25  }
  0x2f   : > { %5180 = vmatpush3.msra.mxu0 %v695_v3  ;;  %5198 = vmatpush3.msra.mxu1 %v919_v14  ;;  %s4688_s27 = sshll.u32 %s647_s26, 6  ;;  %s6698_s3 = scalar_lea.sflag [#allocation4], %s647_s26 }
  0x30   : > { %5181 = vmatprep.subr.mxu0 %v694_v4  ;;  %5211 = vmatprep.subr.mxu1 %v6016_v15  ;;  %s6690_s28 = scalar_lea.hbm %s6841_s1, %s4950_s22 }
  0x31   : > { %5182 = vmatpush3.msra.mxu0 %v694_v4 }
  0x32   : > { %5184 = vmatmul.mubr.msk.f32.vlgmr.msra.gmra.mxu0 %vm699_vm1, %v687_v6 }
  0x33   : > { %5186 = vmatprep.mubr.msk.f32.mxu0 %vm699_vm1, %v688_v7  ;;  %v1137_v7 = vld [vmem:[%s6796_s7] sm:$0xff] }
  0x36   : > { %5187 = vmatmul.mubr.msk.f32.gmra.mxu0 %vm699_vm1, %v689_v8 }
  0x37   : > { %5189 = vmatprep.mubr.msk.f32.mxu0 %vm699_vm1, %v690_v9 }
  0x3a   : > { %5190 = vmatmul.mubr.msk.f32.gmra.mxu0 %vm699_vm1, %v691_v10 }
  0x3b   : > { %5192 = vmatprep.mubr.msk.f32.mxu0 %vm699_vm1, %v692_v11 }
  0x3e   : > { %5193 = vmatmul.mubr.msk.f32.gmra.mxu0 %vm699_vm1, %v693_v12 }
  0xf2   : > { %v5185_v17 = vpop.f32.mrf.mxu0 }
  0xf3   : > { %v841_v19 = vmul.f32 %v5185_v17, %v4700_v16 }
  0xf4   : > { %v794_v20 = vpop.f32.mrf.mxu0 }
  0xf5   : > { %v6025_v21 = vadd.f32 %v4701_v18, %v841_v19  ;;  %v840_v22 = vmul.f32 %v4700_v16, %v794_v20  ;;  %v1330_v19 = vld [vmem:[%s6754_s16] sm:$0xff]  ;;  %v5817_v20 = vmov 0.0  }
  0xf6   : > { %v5188_v23 = vpop.f32.mrf.mxu0  ;;  %663 = vst.msk [vmem:[#allocation2 + $0x38] sm:$0xff] %vm655_vm3, %v5817_v20  ;;  %656 = vst.msk [vmem:[#allocation2] sm:$0xff] %vm655_vm3, %v5817_v20 }
  0xf7   : > { %v4703_v24 = vmul.f32 -1.442695, %v6025_v21  ;;  %v855_v25 = vadd.f32 %v4701_v18, %v840_v22  ;;  %v843_v26 = vmul.f32 %v5188_v23, %v4700_v16  ;;  %657 = vst.msk [vmem:[#allocation2 + $0x8] sm:$0xff] %vm655_vm3, %v5817_v20  ;;  %658 = vst.msk [vmem:[#allocation2 + $0x10] sm:$0xff] %vm655_vm3, %v5817_v20  ;;  %v6092_v22 = vld [vmem:[%s6748_s10] sm:$0xff]  ;;  %v6098_v23 = vld [vmem:[%s6748_s10 + $0x8] sm:$0xff] }
  0xf8   : > { %v804_v27 = vpop.f32.mrf.mxu0  ;;  %659 = vst.msk [vmem:[#allocation2 + $0x18] sm:$0xff] %vm655_vm3, %v5817_v20  ;;  %660 = vst.msk [vmem:[#allocation2 + $0x20] sm:$0xff] %vm655_vm3, %v5817_v20 }
  0xf9   : > { %5563 = vpow2.f32 %v4703_v24  ;;  %v4702_v28 = vmul.f32 -1.442695, %v855_v25  ;;  %v6028_v29 = vadd.f32 %v4701_v18, %v843_v26  ;;  %v842_v30 = vmul.f32 %v4700_v16, %v804_v27  ;;  %661 = vst.msk [vmem:[#allocation2 + $0x28] sm:$0xff] %vm655_vm3, %v5817_v20  ;;  %662 = vst.msk [vmem:[#allocation2 + $0x30] sm:$0xff] %vm655_vm3, %v5817_v20  ;;  %v4718_v24 = vld [vmem:[%s6799_s30] ss:$0 sm:$0xff] }
  0xfa   : > { %v5191_v31 = vpop.f32.mrf.mxu0  ;;  %664 = vst.msk [vmem:[#allocation2 + $0x40] sm:$0xff] %vm655_vm3, %v5817_v20  ;;  %665 = vst.msk [vmem:[#allocation2 + $0x48] sm:$0xff] %vm655_vm3, %v5817_v20  ;;  %v4719_v26 = vld [vmem:[%s6800_s6] ss:$0 sm:$0xff]  ;;  %s649_s30 = scalar_lea.vmem [#allocation3], %s4688_s27  ;;  %s5759_s27 = sshll.u32 %s5818_s21, 4  ;;  %s5760_s27 = int_to_ptr.vmem [resolvable:$false] %s5759_s27 }
  0xfb   : > { %5565 = vpow2.f32 %v4702_v28  ;;  %v4705_v32 = vmul.f32 -1.442695, %v6028_v29  ;;  %v857_v33 = vadd.f32 %v4701_v18, %v842_v30  ;;  %v845_v34 = vmul.f32 %v5191_v31, %v4700_v16  ;;  %666 = vst.msk [vmem:[#allocation2 + $0x50] sm:$0xff] %vm655_vm3, %v5817_v20  ;;  %667 = vst.msk [vmem:[#allocation2 + $0x58] sm:$0xff] %vm655_vm3, %v5817_v20  ;;  %s4622_s4 = sshll.u32 %s649_s30, 4  ;;  %s5761_s22 = scalar_lea.vmem %s5760_s27, 2048  ;;  %s6692_s4 = int_to_ptr.vmem [resolvable:$true] %s4622_s4 }
  0xfc   : > { %v814_v35 = vpop.f32.mrf.mxu0  ;;  %668 = vst.msk [vmem:[#allocation2 + $0x60] sm:$0xff] %vm655_vm3, %v5817_v20  ;;  %669 = vst.msk [vmem:[#allocation2 + $0x68] sm:$0xff] %vm655_vm3, %v5817_v20  ;;  %s5755_s0 = scalar_lea.vmem %s6692_s4, 1024  ;;  %p5762_p0 = scmp.lt.s32.totalorder %s6692_s4, %s5760_s27 }
  0xfd   : > { %5567 = vpow2.f32 %v4705_v32  ;;  %v4704_v36 = vmul.f32 -1.442695, %v857_v33  ;;  %v860_v37 = vadd.f32 %v4701_v18, %v845_v34  ;;  %v844_v38 = vmul.f32 %v4700_v16, %v814_v35  ;;  %670 = vst.msk [vmem:[#allocation2 + $0x70] sm:$0xff] %vm655_vm3, %v5817_v20  ;;  %671 = vst.msk [vmem:[#allocation2 + $0x78] sm:$0xff] %vm655_vm3, %v5817_v20  ;;  %p5756_p11 = scmp.ne.s32.totalorder %s6692_s4, %s5755_s0  ;;  %p5763_p1 = scmp.lt.s32.totalorder %s5761_s22, %s5755_s0 }
  0xfe   : > { %v5194_v39 = vpop.f32.mrf.mxu0  ;;  %672 = vst.msk [vmem:[#allocation2 + $0x80] sm:$0xff] %vm655_vm3, %v5817_v20  ;;  %673 = vst.msk [vmem:[#allocation2 + $0x88] sm:$0xff] %vm655_vm3, %v5817_v20 }
  0xff   : > { %5569 = vpow2.f32 %v4704_v36  ;;  %v4707_v40 = vmul.f32 -1.442695, %v860_v37  ;;  %v859_v41 = vadd.f32 %v4701_v18, %v844_v38  ;;  %v847_v42 = vmul.f32 %v5194_v39, %v4700_v16  ;;  %674 = vst.msk [vmem:[#allocation2 + $0x90] sm:$0xff] %vm655_vm3, %v5817_v20  ;;  %675 = vst.msk [vmem:[#allocation2 + $0x98] sm:$0xff] %vm655_vm3, %v5817_v20  ;;  %p5757_p12 = pnand %p5756_p11, %p5969_p5  ;;  %p5764_p2 = por %p5763_p1, %p5762_p0 }
 0x100   : > { %v824_v43 = vpop.f32.mrf.mxu0  ;;  %676 = vst.msk [vmem:[#allocation2 + $0xa0] sm:$0xff] %vm655_vm3, %v5817_v20  ;;  %677 = vst.msk [vmem:[#allocation2 + $0xa8] sm:$0xff] %vm655_vm3, %v5817_v20 }
 0x101   : > { %5571 = vpow2.f32 %v4707_v40  ;;  %v4706_v44 = vmul.f32 -1.442695, %v859_v41  ;;  %v862_v45 = vadd.f32 %v4701_v18, %v847_v42  ;;  %v846_v46 = vmul.f32 %v4700_v16, %v824_v43  ;;  %678 = vst.msk [vmem:[#allocation2 + $0xb0] sm:$0xff] %vm655_vm3, %v5817_v20  ;;  %679 = vst.msk [vmem:[#allocation2 + $0xb8] sm:$0xff] %vm655_vm3, %v5817_v20  ;;  %p5758_p13 = pneg %p5757_p12 }
 0x102   : > { %680 = vst.msk [vmem:[#allocation2 + $0xc0] sm:$0xff] %vm655_vm3, %v5817_v20  ;;  %681 = vst.msk [vmem:[#allocation2 + $0xc8] sm:$0xff] %vm655_vm3, %v5817_v20 }
 0x103   : > { %5573 = vpow2.f32 %v4706_v44  ;;  %v4709_v47 = vmul.f32 -1.442695, %v862_v45  ;;  %v861_v48 = vadd.f32 %v4701_v18, %v846_v46  ;;  %682 = vst.msk [vmem:[#allocation2 + $0xd0] sm:$0xff] %vm655_vm3, %v5817_v20  ;;  %683 = vst.msk [vmem:[#allocation2 + $0xd8] sm:$0xff] %vm655_vm3, %v5817_v20  ;;  %p5765_p3 = pnand %p5764_p2, %p5758_p13 }
 0x104   : > { %684 = vst.msk [vmem:[#allocation2 + $0xe0] sm:$0xff] %vm655_vm3, %v5817_v20  ;;  %685 = vst.msk [vmem:[#allocation2 + $0xe8] sm:$0xff] %vm655_vm3, %v5817_v20 }
 0x105   : > { %5575 = vpow2.f32 %v4709_v47  ;;  %v4708_v49 = vmul.f32 -1.442695, %v861_v48 }
 0x106   : > { %v5564_v50 = vpop.eup %5563 }
 0x107   : > { %v888_v51 = vadd.f32 1.0, %v5564_v50  ;;  %5577 = vpow2.f32 %v4708_v49 }
 0x108   : > { %v5566_v52 = vpop.eup %5565 }
 0x109   : > { %v887_v53 = vadd.f32 1.0, %v5566_v52  ;;  %5579 = vrcp.f32 %v888_v51  ;;  %v4736_v52 = vld [vmem:[%s6746_s8] ss:$0 sm:$0xff] }
 0x10a   : > { %v5568_v54 = vpop.eup %5567 }
 0x10b   : > { %5581 = vrcp.f32 %v887_v53  ;;  %v890_v55 = vadd.f32 1.0, %v5568_v54 }
 0x10c   : > { %v5570_v56 = vpop.eup %5569 }
 0x10d   : > { %v889_v57 = vadd.f32 1.0, %v5570_v56  ;;  %5583 = vrcp.f32 %v890_v55 }
 0x10e   : > { %v5572_v58 = vpop.eup %5571 }
 0x10f   : > { %5585 = vrcp.f32 %v889_v57  ;;  %v892_v59 = vadd.f32 1.0, %v5572_v58  ;;  %v4737_v57 = vld [vmem:[%s6747_s9] ss:$0 sm:$0xff] }
 0x110   : > { %v5574_v60 = vpop.eup %5573 }
 0x111   : > { %v891_v61 = vadd.f32 1.0, %v5574_v60  ;;  %5587 = vrcp.f32 %v892_v59 }
 0x112   : > { %v5576_v62 = vpop.eup %5575 }
 0x113   : > { %5589 = vrcp.f32 %v891_v61  ;;  %v894_v63 = vadd.f32 1.0, %v5576_v62 }
 0x114   : > { %v5578_v0 = vpop.eup %5577 }
 0x115   : > { %v893_v1 = vadd.f32 1.0, %v5578_v0  ;;  %5591 = vrcp.f32 %v894_v63 }
 0x116   : > { %v5580_v2 = vpop.eup %5579 }
 0x117   : > { %5593 = vrcp.f32 %v893_v1  ;;  %v912_v5 = vmul.f32 %v5580_v2, %v6025_v21  ;;  %v1331_v21 = vld [vmem:[%s6755_s17] sm:$0xff] }
 0x118   : > { %v5582_v3 = vpop.eup %5581  ;;  %5227 = vmatprep.subr.mxu0 %v1331_v21 }
 0x119   : > { %v911_v4 = vmul.f32 %v5582_v3, %v855_v25  ;;  %5228 = vmatpush3.msra.mxu0 %v1331_v21 }
 0x11a   : > { %v5584_v6 = vpop.eup %5583  ;;  %5255 = vmatprep.subr.mxu0 %v6098_v23 }
 0x11b   : > { %5199 = vmatprep.mubr.msk.f32.mxu1 %vm921_vm2, %v911_v4  ;;  %v914_v10 = vmul.f32 %v5584_v6, %v6028_v29 }
 0x11c   : > { %v5586_v8 = vpop.eup %5585  ;;  %5200 = vmatmul.mubr.msk.f32.vlgmr.msra.gmra.mxu1 %vm921_vm2, %v912_v5 }
 0x11d   : > { %v913_v9 = vmul.f32 %v5586_v8, %v857_v33  ;;  %5212 = vmatpush3.msra.mxu1 %v6016_v15 }
 0x11e   : > { %5213 = vmatprep.subr.mxu1 %v1137_v7  ;;  %v5588_v11 = vpop.eup %5587 }
 0x11f   : > { %5202 = vmatprep.mubr.msk.f32.mxu1 %vm921_vm2, %v913_v9  ;;  %5214 = vmatpush3.msra.mxu1 %v1137_v7  ;;  %v916_v14 = vmul.f32 %v5588_v11, %v860_v37 }
 0x120   : > { %v5590_v12 = vpop.eup %5589  ;;  %5203 = vmatmul.mubr.msk.f32.gmra.mxu1 %vm921_vm2, %v914_v10  ;;  %5241 = vmatprep.subr.mxu1 %v1330_v19 }
 0x121   : > { %v915_v13 = vmul.f32 %v5590_v12, %v859_v41 }
 0x122   : > { %v5592_v16 = vpop.eup %5591 }
 0x123   : > { %5205 = vmatprep.mubr.msk.f32.mxu1 %vm921_vm2, %v915_v13  ;;  %v918_v15 = vmul.f32 %v5592_v16, %v862_v45 }
 0x124   : > { %v5594_v17 = vpop.eup %5593  ;;  %5206 = vmatmul.mubr.msk.f32.gmra.mxu1 %vm921_vm2, %v916_v14 }
 0x125   : > { %v917_v18 = vmul.f32 %v5594_v17, %v861_v48 }
 0x127   : > { %5208 = vmatprep.mubr.msk.f32.mxu1 %vm921_vm2, %v917_v18 }
 0x128   : > { %5209 = vmatmul.mubr.msk.f32.gmra.mxu1 %vm921_vm2, %v918_v15 }
 0x129   : > { %5215 = vmatprep.mubr.msk.f32.mxu1 %vm921_vm2, %v911_v4 }
 0x12c   : > { %5216 = vmatmul.mubr.msk.f32.vlgmr.msra.gmra.mxu1 %vm921_vm2, %v912_v5 }
 0x12d   : > { %5218 = vmatprep.mubr.msk.f32.mxu1 %vm921_vm2, %v913_v9  ;;  %5242 = vmatpush3.msra.mxu1 %v1330_v19 }
 0x12e   : > { %5269 = vmatprep.subr.mxu1 %v6092_v22 }
 0x130   : > { %5219 = vmatmul.mubr.msk.f32.gmra.mxu1 %vm921_vm2, %v914_v10 }
 0x131   : > { %5221 = vmatprep.mubr.msk.f32.mxu1 %vm921_vm2, %v915_v13 }
 0x134   : > { %5222 = vmatmul.mubr.msk.f32.gmra.mxu1 %vm921_vm2, %v916_v14 }
 0x135   : > { %5224 = vmatprep.mubr.msk.f32.mxu1 %vm921_vm2, %v917_v18 }
 0x138   : > { %5225 = vmatmul.mubr.msk.f32.gmra.mxu1 %vm921_vm2, %v918_v15 }
 0x1dc   : > { %v5201_v25 = vpop.f32.mrf.mxu1 }
 0x1dd   : > { %v1059_v27 = vmul.f32 %v5201_v25, %v4718_v24 }
 0x1de   : > { %v1012_v28 = vpop.f32.mrf.mxu1 }
 0x1df   : > { %v6107_v29 = vadd.f32 %v4719_v26, %v1059_v27  ;;  %v1058_v30 = vmul.f32 %v4718_v24, %v1012_v28 }
 0x1e0   : > { %v5204_v31 = vpop.f32.mrf.mxu1 }
 0x1e1   : > { %v4721_v32 = vmul.f32 -1.442695, %v6107_v29  ;;  %v6110_v33 = vadd.f32 %v4719_v26, %v1058_v30  ;;  %v1061_v34 = vmul.f32 %v5204_v31, %v4718_v24 }
 0x1e2   : > { %v1022_v35 = vpop.f32.mrf.mxu1 }
 0x1e3   : > { %5595 = vpow2.f32 %v4721_v32  ;;  %v4720_v36 = vmul.f32 -1.442695, %v6110_v33  ;;  %v6113_v37 = vadd.f32 %v4719_v26, %v1061_v34  ;;  %v1060_v38 = vmul.f32 %v4718_v24, %v1022_v35 }
 0x1e4   : > { %v5207_v39 = vpop.f32.mrf.mxu1 }
 0x1e5   : > { %5597 = vpow2.f32 %v4720_v36  ;;  %v4723_v40 = vmul.f32 -1.442695, %v6113_v37  ;;  %v6116_v41 = vadd.f32 %v4719_v26, %v1060_v38  ;;  %v1063_v42 = vmul.f32 %v5207_v39, %v4718_v24 }
 0x1e6   : > { %v1032_v43 = vpop.f32.mrf.mxu1 }
 0x1e7   : > { %5599 = vpow2.f32 %v4723_v40  ;;  %v4722_v44 = vmul.f32 -1.442695, %v6116_v41  ;;  %v6119_v45 = vadd.f32 %v4719_v26, %v1063_v42  ;;  %v1062_v46 = vmul.f32 %v4718_v24, %v1032_v43 }
 0x1e8   : > { %v5210_v47 = vpop.f32.mrf.mxu1 }
 0x1e9   : > { %5601 = vpow2.f32 %v4722_v44  ;;  %v4725_v48 = vmul.f32 -1.442695, %v6119_v45  ;;  %v6122_v49 = vadd.f32 %v4719_v26, %v1062_v46  ;;  %v1065_v50 = vmul.f32 %v5210_v47, %v4718_v24 }
 0x1ea   : > { %v1042_v51 = vpop.f32.mrf.mxu1 }
 0x1eb   : > { %5603 = vpow2.f32 %v4725_v48  ;;  %v4724_v53 = vmul.f32 -1.442695, %v6122_v49  ;;  %v6128_v54 = vadd.f32 %v4719_v26, %v1065_v50  ;;  %v1064_v55 = vmul.f32 %v4718_v24, %v1042_v51 }
 0x1ec   : > { %v5217_v56 = vpop.f32.mrf.mxu1 }
 0x1ed   : > { %5605 = vpow2.f32 %v4724_v53  ;;  %v4727_v58 = vmul.f32 -1.442695, %v6128_v54  ;;  %v6134_v59 = vadd.f32 %v4719_v26, %v1064_v55  ;;  %v1252_v60 = vmul.f32 %v5217_v56, %v4736_v52 }
 0x1ee   : > { %v1205_v61 = vpop.f32.mrf.mxu1 }
 0x1ef   : > { %5607 = vpow2.f32 %v4727_v58  ;;  %v4726_v62 = vmul.f32 -1.442695, %v6134_v59  ;;  %v6137_v63 = vadd.f32 %v4737_v57, %v1252_v60  ;;  %v1251_v0 = vmul.f32 %v4736_v52, %v1205_v61 }
 0x1f0   : > { %v5596_v1 = vpop.eup %5595  ;;  %v5220_v2 = vpop.f32.mrf.mxu1 }
 0x1f1   : > { %v1106_v3 = vadd.f32 1.0, %v5596_v1  ;;  %5609 = vpow2.f32 %v4726_v62  ;;  %v4739_v4 = vmul.f32 -1.442695, %v6137_v63  ;;  %v6140_v5 = vadd.f32 %v4737_v57, %v1251_v0  ;;  %v6167_v1 = vld [vmem:[%s6748_s10 + $0x18] sm:$0xff] }
 0x1f2   : > { %v5598_v6 = vpop.eup %5597  ;;  %v1254_v7 = vmul.f32 %v5220_v2, %v4736_v52  ;;  %v1215_v8 = vpop.f32.mrf.mxu1 }
 0x1f3   : > { %5611 = vrcp.f32 %v1106_v3  ;;  %v1105_v9 = vadd.f32 1.0, %v5598_v6  ;;  %v4738_v10 = vmul.f32 -1.442695, %v6140_v5  ;;  %v1253_v11 = vmul.f32 %v4736_v52, %v1215_v8 }
 0x1f4   : > { %v5600_v12 = vpop.eup %5599  ;;  %5613 = vpow2.f32 %v4739_v4  ;;  %v6143_v13 = vadd.f32 %v4737_v57, %v1254_v7  ;;  %v5223_v14 = vpop.f32.mrf.mxu1 }
 0x1f5   : > { %5615 = vrcp.f32 %v1105_v9  ;;  %v1108_v16 = vadd.f32 1.0, %v5600_v12  ;;  %v6145_v17 = vadd.f32 %v4737_v57, %v1253_v11  ;;  %v1256_v18 = vmul.f32 %v5223_v14, %v4736_v52 }
 0x1f6   : > { %v5602_v15 = vpop.eup %5601  ;;  %5617 = vpow2.f32 %v4738_v10  ;;  %v4741_v19 = vmul.f32 -1.442695, %v6143_v13  ;;  %v1225_v20 = vpop.f32.mrf.mxu1 }
 0x1f7   : > { %5619 = vrcp.f32 %v1108_v16  ;;  %v1107_v21 = vadd.f32 1.0, %v5602_v15  ;;  %v4740_v24 = vmul.f32 -1.442695, %v6145_v17  ;;  %v6149_v25 = vadd.f32 %v4737_v57, %v1256_v18 }
 0x1f8   : > { %v5604_v26 = vpop.eup %5603  ;;  %5621 = vpow2.f32 %v4741_v19  ;;  %v1255_v27 = vmul.f32 %v4736_v52, %v1225_v20  ;;  %v5226_v28 = vpop.f32.mrf.mxu1 }
 0x1f9   : > { %5623 = vrcp.f32 %v1107_v21  ;;  %v1110_v30 = vadd.f32 1.0, %v5604_v26  ;;  %v4743_v31 = vmul.f32 -1.442695, %v6149_v25  ;;  %v1258_v32 = vmul.f32 %v5226_v28, %v4736_v52  ;;  %v6182_v21 = vld [vmem:[#allocation2 + $0x7] sm:$0xff] }
 0x1fa   : > { %v5606_v34 = vpop.eup %5605  ;;  %5625 = vpow2.f32 %v4740_v24  ;;  %v6152_v35 = vadd.f32 %v4737_v57, %v1255_v27  ;;  %v1235_v36 = vpop.f32.mrf.mxu1 }
 0x1fb   : > { %5627 = vrcp.f32 %v1110_v30  ;;  %v1109_v38 = vadd.f32 1.0, %v5606_v34  ;;  %v6154_v39 = vadd.f32 %v4737_v57, %v1258_v32  ;;  %v1257_v40 = vmul.f32 %v4736_v52, %v1235_v36 }
 0x1fc   : > { %v5608_v42 = vpop.eup %5607  ;;  %5629 = vpow2.f32 %v4743_v31  ;;  %v4742_v43 = vmul.f32 -1.442695, %v6152_v35 }
 0x1fd   : > { %5631 = vrcp.f32 %v1109_v38  ;;  %v1112_v44 = vadd.f32 1.0, %v5608_v42  ;;  %v4745_v46 = vmul.f32 -1.442695, %v6154_v39  ;;  %v6158_v47 = vadd.f32 %v4737_v57, %v1257_v40  ;;  %v6224_v40 = vld [vmem:[#allocation2 + $0x8] sm:$0xff] }
 0x1fe   : > { %v5610_v48 = vpop.eup %5609  ;;  %5633 = vpow2.f32 %v4742_v43 }
 0x1ff   : > { %5635 = vrcp.f32 %v1112_v44  ;;  %v1111_v50 = vadd.f32 1.0, %v5610_v48  ;;  %v4744_v51 = vmul.f32 -1.442695, %v6158_v47 }
 0x200   : > { %v5612_v53 = vpop.eup %5611  ;;  %5637 = vpow2.f32 %v4745_v46 }
 0x201   : > { %v5614_v55 = vpop.eup %5613  ;;  %5639 = vrcp.f32 %v1111_v50  ;;  %v1130_v57 = vmul.f32 %v5612_v53, %v6107_v29 }
 0x202   : > { %v5616_v52 = vpop.eup %5615  ;;  %v1299_v56 = vadd.f32 1.0, %v5614_v55  ;;  %5641 = vpow2.f32 %v4744_v51 }
 0x203   : > { %v5618_v58 = vpop.eup %5617  ;;  %v1129_v60 = vmul.f32 %v5616_v52, %v6110_v33  ;;  %v1597_v52 = vld [vmem:[%s6748_s10 + $0x38] sm:$0xff] }
 0x204   : > { %v5620_v61 = vpop.eup %5619  ;;  %5643 = vrcp.f32 %v1299_v56  ;;  %v1298_v62 = vadd.f32 1.0, %v5618_v58  ;;  %v6269_v58 = vld [vmem:[#allocation2 + $0x9] sm:$0xff] }
 0x205   : > { %v5622_v0 = vpop.eup %5621  ;;  %5243 = vmatprep.mubr.msk.f32.mxu1 %vm655_vm3, %v1129_v60  ;;  %v1132_v6 = vmul.f32 %v5620_v61, %v6113_v37  ;;  %6801 = vst [vmem:[#allocation12_spill] sm:$0xff] %v6269_v58 }
 0x206   : > { %v5624_v2 = vpop.eup %5623  ;;  %5645 = vrcp.f32 %v1298_v62  ;;  %v1301_v3 = vadd.f32 1.0, %v5622_v0  ;;  %5244 = vmatmul.mubr.msk.f32.vlgmr.msra.gmra.mxu1 %vm655_vm3, %v1130_v57  ;;  %v1596_v57 = vld [vmem:[%s6748_s10 + $0x30] sm:$0xff] }
 0x207   : > { %v5626_v4 = vpop.eup %5625  ;;  %v1131_v33 = vmul.f32 %v5624_v2, %v6116_v41  ;;  %5270 = vmatpush3.msra.mxu1 %v6092_v22 }
 0x208   : > { %v5628_v29 = vpop.eup %5627  ;;  %5647 = vrcp.f32 %v1301_v3  ;;  %v1300_v7 = vadd.f32 1.0, %v5626_v4  ;;  %5297 = vmatprep.subr.mxu1 %v6167_v1 }
 0x209   : > { %v5630_v8 = vpop.eup %5629  ;;  %5246 = vmatprep.mubr.msk.f32.mxu1 %vm655_vm3, %v1131_v33  ;;  %v1134_v22 = vmul.f32 %v5628_v29, %v6119_v45  ;;  %v1598_v29 = vld [vmem:[%s6748_s10 + $0x40] sm:$0xff] }
 0x20a   : > { %v5632_v9 = vpop.eup %5631  ;;  %5649 = vrcp.f32 %v1300_v7  ;;  %v1303_v10 = vadd.f32 1.0, %v5630_v8  ;;  %5247 = vmatmul.mubr.msk.f32.gmra.mxu1 %vm655_vm3, %v1132_v6  ;;  %v6325_v8 = vld [vmem:[#allocation2 + $0xe0] sm:$0xff] }
 0x20b   : > { %v5634_v11 = vpop.eup %5633  ;;  %v1133_v41 = vmul.f32 %v5632_v9, %v6122_v49  ;;  %6802 = vst [vmem:[#allocation13_spill] sm:$0xff] %v6325_v8  ;;  %v6340_v9 = vld [vmem:[#allocation2 + $0xdf] sm:$0xff] }
 0x20c   : > { %v5636_v12 = vpop.eup %5635  ;;  %5651 = vrcp.f32 %v1303_v10  ;;  %v1302_v37 = vadd.f32 1.0, %v5634_v11  ;;  %6803 = vst [vmem:[#allocation14_spill] sm:$0xff] %v6340_v9  ;;  %v6351_v10 = vld [vmem:[#allocation2 + $0xe1] sm:$0xff] }
 0x20d   : > { %v5638_v14 = vpop.eup %5637  ;;  %5249 = vmatprep.mubr.msk.f32.mxu1 %vm655_vm3, %v1133_v41  ;;  %v1136_v20 = vmul.f32 %v5636_v12, %v6128_v54  ;;  %6804 = vst [vmem:[#allocation15_spill] sm:$0xff] %v6351_v10 }
 0x20e   : > { %v5640_v16 = vpop.eup %5639  ;;  %5653 = vrcp.f32 %v1302_v37  ;;  %v1305_v18 = vadd.f32 1.0, %v5638_v14  ;;  %5250 = vmatmul.mubr.msk.f32.gmra.mxu1 %vm655_vm3, %v1134_v22 }
 0x20f   : > { %v5642_v15 = vpop.eup %5641  ;;  %v1135_v19 = vmul.f32 %v5640_v16, %v6134_v59 }
 0x210   : > { %5655 = vrcp.f32 %v1305_v18  ;;  %v1304_v49 = vadd.f32 1.0, %v5642_v15 }
 0x211   : > { %v5644_v45 = vpop.eup %5643  ;;  %5252 = vmatprep.mubr.msk.f32.mxu1 %vm655_vm3, %v1135_v19  ;;  %v2985_v19 = vld [vmem:[%s6751_s13 + $0x8] sm:$0xff] }
 0x212   : > { %v1323_v24 = vmul.f32 %v5644_v45, %v6137_v63  ;;  %5657 = vrcp.f32 %v1304_v49  ;;  %5253 = vmatmul.mubr.msk.f32.gmra.mxu1 %vm655_vm3, %v1136_v20  ;;  %v1592_v63 = vld [vmem:[%s6748_s10 + $0x10] sm:$0xff]  ;;  %v2984_v20 = vld [vmem:[%s6751_s13] sm:$0xff] }
 0x213   : > { %v5646_v26 = vpop.eup %5645  ;;  %5271 = vmatprep.mubr.msk.f32.mxu1 %vm655_vm3, %v6182_v21 }
 0x214   : > { %1601 = vst.msk [vmem:[#allocation2 + $0x38] sm:$0xff] %vm655_vm3, %v1323_v24  ;;  %v1322_v54 = vmul.f32 %v5646_v26, %v6140_v5 }
 0x215   : > { %v5648_v59 = vpop.eup %5647 }
 0x216   : > { %1600 = vst.msk [vmem:[#allocation2 + $0x20] sm:$0xff] %vm655_vm3, %v1322_v54  ;;  %v1325_v27 = vmul.f32 %v5648_v59, %v6143_v13  ;;  %5229 = vmatprep.mubr.msk.f32.mxu0 %vm655_vm3, %v1322_v54 }
 0x217   : > { %v5650_v28 = vpop.eup %5649  ;;  %5230 = vmatmul.mubr.msk.f32.vlgmr.msra.gmra.mxu0 %vm655_vm3, %v1323_v24 }
 0x218   : > { %1603 = vst.msk [vmem:[#allocation2 + $0x68] sm:$0xff] %vm655_vm3, %v1325_v27  ;;  %v1324_v30 = vmul.f32 %v5650_v28, %v6145_v17  ;;  %5256 = vmatpush3.msra.mxu0 %v6098_v23 }
 0x219   : > { %v5652_v5 = vpop.eup %5651  ;;  %5283 = vmatprep.subr.mxu0 %v1592_v63 }
 0x21a   : > { %1602 = vst.msk [vmem:[#allocation2 + $0x50] sm:$0xff] %vm655_vm3, %v1324_v30  ;;  %v1327_v13 = vmul.f32 %v5652_v5, %v6149_v25  ;;  %5232 = vmatprep.mubr.msk.f32.mxu0 %vm655_vm3, %v1324_v30  ;;  %v1595_v25 = vld [vmem:[%s6748_s10 + $0x28] sm:$0xff] }
 0x21b   : > { %v5654_v31 = vpop.eup %5653  ;;  %5233 = vmatmul.mubr.msk.f32.gmra.mxu0 %vm655_vm3, %v1325_v27  ;;  %v6211_v17 = vld [vmem:[#allocation2 + $0x37] sm:$0xff] }
 0x21c   : > { %1605 = vst.msk [vmem:[#allocation2 + $0x98] sm:$0xff] %vm655_vm3, %v1327_v13  ;;  %v1326_v32 = vmul.f32 %v5654_v31, %v6152_v35  ;;  %v6249_v48 = vld [vmem:[#allocation2 + $0x38] sm:$0xff] }
 0x21d   : > { %v5656_v34 = vpop.eup %5655  ;;  %v1609_v36 = vld [vmem:[#allocation2 + $0x1f] sm:$0xff] }
 0x21e   : > { %1604 = vst.msk [vmem:[#allocation2 + $0x80] sm:$0xff] %vm655_vm3, %v1326_v32  ;;  %v1329_v23 = vmul.f32 %v5656_v34, %v6154_v39  ;;  %5235 = vmatprep.mubr.msk.f32.mxu0 %vm655_vm3, %v1326_v32  ;;  %5272 = vmatmul.mubr.msk.f32.vlgmr.msra.gmra.mxu1 %vm655_vm3, %v1609_v36  ;;  %v1617_v44 = vld [vmem:[#allocation2 + $0x20] sm:$0xff] }
 0x21f   : > { %v5658_v38 = vpop.eup %5657  ;;  %5236 = vmatmul.mubr.msk.f32.gmra.mxu0 %vm655_vm3, %v1327_v13  ;;  %5274 = vmatprep.mubr.msk.f32.mxu1 %vm655_vm3, %v6211_v17  ;;  %v6230_v42 = vld [vmem:[#allocation2 + $0x67] sm:$0xff]  ;;  %v1884_v62 = vld [vmem:[#allocation2 + $0x39] sm:$0xff] }
 0x220   : > { %1607 = vst.msk [vmem:[#allocation2 + $0xc8] sm:$0xff] %vm655_vm3, %v1329_v23  ;;  %v1328_v35 = vmul.f32 %v5658_v38, %v6158_v47  ;;  %5298 = vmatpush3.msra.mxu1 %v6167_v1  ;;  %v1594_v47 = vld [vmem:[%s6748_s10 + $0x20] sm:$0xff]  ;;  %v1620_v53 = vld [vmem:[#allocation2 + $0x68] sm:$0xff] }
 0x221   : > { %v6222_v39 = vld [vmem:[#allocation2 + $0x4f] sm:$0xff]  ;;  %5325 = vmatprep.subr.mxu1 %v1595_v25  ;;  %v1883_v61 = vld [vmem:[#allocation2 + $0x21] sm:$0xff] }
 0x222   : > { %1606 = vst.msk [vmem:[#allocation2 + $0xb0] sm:$0xff] %vm655_vm3, %v1328_v35  ;;  %5238 = vmatprep.mubr.msk.f32.mxu0 %vm655_vm3, %v1328_v35  ;;  %5275 = vmatmul.mubr.msk.f32.gmra.mxu1 %vm655_vm3, %v6222_v39  ;;  %v1619_v51 = vld [vmem:[#allocation2 + $0x50] sm:$0xff]  ;;  %v6388_v35 = vld [vmem:[%s6751_s13 + $0x18] sm:$0xff] }
 0x223   : > { %5239 = vmatmul.mubr.msk.f32.gmra.mxu0 %vm655_vm3, %v1329_v23  ;;  %5277 = vmatprep.mubr.msk.f32.mxu1 %vm655_vm3, %v6230_v42  ;;  %v6241_v46 = vld [vmem:[#allocation2 + $0x97] sm:$0xff]  ;;  %v1886_v2 = vld [vmem:[#allocation2 + $0x69] sm:$0xff]  ;;  %6814 = vst [vmem:[#allocation25_spill] sm:$0xff] %v6388_v35 }
 0x224   : > { %5257 = vmatprep.mubr.msk.f32.mxu0 %vm655_vm3, %v6224_v40  ;;  %v1622_v56 = vld [vmem:[#allocation2 + $0x98] sm:$0xff] }
 0x225   : > { %v6237_v43 = vld [vmem:[#allocation2 + $0x7f] sm:$0xff]  ;;  %v1885_v1 = vld [vmem:[#allocation2 + $0x51] sm:$0xff] }
 0x226   : > { %5278 = vmatmul.mubr.msk.f32.gmra.mxu1 %vm655_vm3, %v6237_v43  ;;  %v1621_v55 = vld [vmem:[#allocation2 + $0x80] sm:$0xff] }
 0x227   : > { %5258 = vmatmul.mubr.msk.f32.vlgmr.msra.gmra.mxu0 %vm655_vm3, %v1617_v44  ;;  %5280 = vmatprep.mubr.msk.f32.mxu1 %vm655_vm3, %v6241_v46  ;;  %v2034_v0 = vld [vmem:[#allocation2 + $0xc7] sm:$0xff]  ;;  %v1888_v4 = vld [vmem:[#allocation2 + $0x99] sm:$0xff] }
 0x228   : > { %5284 = vmatpush3.msra.mxu0 %v1592_v63  ;;  %5260 = vmatprep.mubr.msk.f32.mxu0 %vm655_vm3, %v6249_v48  ;;  %v1887_v3 = vld [vmem:[#allocation2 + $0x81] sm:$0xff]  ;;  %v2324_v6 = vld [vmem:[#allocation2 + $0xc9] sm:$0xff] }
 0x229   : > { %v6253_v50 = vld [vmem:[#allocation2 + $0xaf] sm:$0xff]  ;;  %5311 = vmatprep.subr.mxu0 %v1594_v47 }
 0x22a   : > { %5281 = vmatmul.mubr.msk.f32.gmra.mxu1 %vm655_vm3, %v6253_v50  ;;  %v1623_v60 = vld [vmem:[#allocation2 + $0xb0] sm:$0xff]  ;;  %v2179_v7 = vld [vmem:[#allocation2 + $0xc8] sm:$0xff] }
 0x22b   : > { %5261 = vmatmul.mubr.msk.f32.gmra.mxu0 %vm655_vm3, %v1619_v51  ;;  %5299 = vmatprep.mubr.msk.f32.mxu1 %vm655_vm3, %v1609_v36  ;;  %v1889_v33 = vld [vmem:[#allocation2 + $0xb1] sm:$0xff] }
 0x22c   : > { %5263 = vmatprep.mubr.msk.f32.mxu0 %vm655_vm3, %v1620_v53  ;;  %v6374_v63 = vld [vmem:[%s6751_s13 + $0x10] sm:$0xff] }
 0x22d   : > { %6809 = vst [vmem:[#allocation20_spill] sm:$0xff] %v6374_v63 }
 0x22e   : > { %5300 = vmatmul.mubr.msk.f32.vlgmr.msra.gmra.mxu1 %vm655_vm3, %v6211_v17 }
 0x22f   : > { %5264 = vmatmul.mubr.msk.f32.gmra.mxu0 %vm655_vm3, %v1621_v55  ;;  %5302 = vmatprep.mubr.msk.f32.mxu1 %vm655_vm3, %v6222_v39 }
 0x230   : > { %5266 = vmatprep.mubr.msk.f32.mxu0 %vm655_vm3, %v1622_v56  ;;  %5326 = vmatpush3.msra.mxu1 %v1595_v25 }
 0x231   : > { %5353 = vmatprep.subr.mxu1 %v1597_v52 }
 0x232   : > { %5303 = vmatmul.mubr.msk.f32.gmra.mxu1 %vm655_vm3, %v6230_v42 }
 0x233   : > { %5267 = vmatmul.mubr.msk.f32.gmra.mxu0 %vm655_vm3, %v1623_v60  ;;  %5305 = vmatprep.mubr.msk.f32.mxu1 %vm655_vm3, %v6237_v43 }
 0x234   : > { %5285 = vmatprep.mubr.msk.f32.mxu0 %vm655_vm3, %v6269_v58 }
 0x236   : > { %5306 = vmatmul.mubr.msk.f32.gmra.mxu1 %vm655_vm3, %v6241_v46 }
 0x237   : > { %5286 = vmatmul.mubr.msk.f32.vlgmr.msra.gmra.mxu0 %vm655_vm3, %v1883_v61  ;;  %5308 = vmatprep.mubr.msk.f32.mxu1 %vm655_vm3, %v6253_v50 }
 0x238   : > { %5312 = vmatpush3.msra.mxu0 %v1594_v47  ;;  %5288 = vmatprep.mubr.msk.f32.mxu0 %vm655_vm3, %v1884_v62 }
 0x239   : > { %5339 = vmatprep.subr.mxu0 %v1596_v57 }
 0x23a   : > { %5309 = vmatmul.mubr.msk.f32.gmra.mxu1 %vm655_vm3, %v2034_v0 }
 0x23b   : > { %5289 = vmatmul.mubr.msk.f32.gmra.mxu0 %vm655_vm3, %v1885_v1  ;;  %5327 = vmatprep.mubr.msk.f32.mxu1 %vm655_vm3, %v1883_v61 }
 0x23c   : > { %5291 = vmatprep.mubr.msk.f32.mxu0 %vm655_vm3, %v1886_v2 }
 0x23e   : > { %5328 = vmatmul.mubr.msk.f32.vlgmr.msra.gmra.mxu1 %vm655_vm3, %v1884_v62 }
 0x23f   : > { %5292 = vmatmul.mubr.msk.f32.gmra.mxu0 %vm655_vm3, %v1887_v3  ;;  %5330 = vmatprep.mubr.msk.f32.mxu1 %vm655_vm3, %v1885_v1 }
 0x240   : > { %5294 = vmatprep.mubr.msk.f32.mxu0 %vm655_vm3, %v1888_v4  ;;  %5354 = vmatpush3.msra.mxu1 %v1597_v52 }
 0x241   : > { %5381 = vmatprep.subr.mxu1 %v2985_v19 }
 0x242   : > { %5331 = vmatmul.mubr.msk.f32.gmra.mxu1 %vm655_vm3, %v1886_v2 }
 0x243   : > { %5295 = vmatmul.mubr.msk.f32.gmra.mxu0 %vm655_vm3, %v1889_v33  ;;  %5333 = vmatprep.mubr.msk.f32.mxu1 %vm655_vm3, %v1887_v3 }
 0x244   : > { %5313 = vmatprep.mubr.msk.f32.mxu0 %vm655_vm3, %v1617_v44 }
 0x246   : > { %5334 = vmatmul.mubr.msk.f32.gmra.mxu1 %vm655_vm3, %v1888_v4 }
 0x247   : > { %5314 = vmatmul.mubr.msk.f32.vlgmr.msra.gmra.mxu0 %vm655_vm3, %v6249_v48  ;;  %5336 = vmatprep.mubr.msk.f32.mxu1 %vm655_vm3, %v1889_v33 }
 0x248   : > { %5340 = vmatpush3.msra.mxu0 %v1596_v57  ;;  %5316 = vmatprep.mubr.msk.f32.mxu0 %vm655_vm3, %v1619_v51 }
 0x249   : > { %5367 = vmatprep.subr.mxu0 %v1598_v29 }
 0x24a   : > { %5337 = vmatmul.mubr.msk.f32.gmra.mxu1 %vm655_vm3, %v2324_v6 }
 0x24b   : > { %5317 = vmatmul.mubr.msk.f32.gmra.mxu0 %vm655_vm3, %v1620_v53  ;;  %5355 = vmatprep.mubr.msk.f32.mxu1 %vm655_vm3, %v6249_v48 }
 0x24c   : > { %5319 = vmatprep.mubr.msk.f32.mxu0 %vm655_vm3, %v1621_v55 }
 0x24e   : > { %5356 = vmatmul.mubr.msk.f32.vlgmr.msra.gmra.mxu1 %vm655_vm3, %v1619_v51 }
 0x24f   : > { %5320 = vmatmul.mubr.msk.f32.gmra.mxu0 %vm655_vm3, %v1622_v56  ;;  %5358 = vmatprep.mubr.msk.f32.mxu1 %vm655_vm3, %v1620_v53 }
 0x250   : > { %5322 = vmatprep.mubr.msk.f32.mxu0 %vm655_vm3, %v1623_v60  ;;  %5382 = vmatpush3.msra.mxu1 %v2985_v19 }
 0x251   : > { %5409 = vmatprep.subr.mxu1 %v6374_v63 }
 0x252   : > { %5359 = vmatmul.mubr.msk.f32.gmra.mxu1 %vm655_vm3, %v1621_v55 }
 0x253   : > { %5323 = vmatmul.mubr.msk.f32.gmra.mxu0 %vm655_vm3, %v2179_v7  ;;  %5361 = vmatprep.mubr.msk.f32.mxu1 %vm655_vm3, %v1622_v56 }
 0x254   : > { %5341 = vmatprep.mubr.msk.f32.mxu0 %vm655_vm3, %v6211_v17 }
 0x256   : > { %5362 = vmatmul.mubr.msk.f32.gmra.mxu1 %vm655_vm3, %v1623_v60 }
 0x257   : > { %5342 = vmatmul.mubr.msk.f32.vlgmr.msra.gmra.mxu0 %vm655_vm3, %v6222_v39  ;;  %5364 = vmatprep.mubr.msk.f32.mxu1 %vm655_vm3, %v2179_v7 }
 0x258   : > { %5368 = vmatpush3.msra.mxu0 %v1598_v29  ;;  %5344 = vmatprep.mubr.msk.f32.mxu0 %vm655_vm3, %v6230_v42 }
 0x259   : > { %5395 = vmatprep.subr.mxu0 %v2984_v20 }
 0x25a   : > { %5365 = vmatmul.mubr.msk.f32.gmra.mxu1 %vm655_vm3, %v6325_v8 }
 0x25b   : > { %5345 = vmatmul.mubr.msk.f32.gmra.mxu0 %vm655_vm3, %v6237_v43  ;;  %5383 = vmatprep.mubr.msk.f32.mxu1 %vm655_vm3, %v6224_v40 }
 0x25c   : > { %5347 = vmatprep.mubr.msk.f32.mxu0 %vm655_vm3, %v6241_v46 }
 0x25f   : > { %5348 = vmatmul.mubr.msk.f32.gmra.mxu0 %vm655_vm3, %v6253_v50 }
 0x260   : > { %5350 = vmatprep.mubr.msk.f32.mxu0 %vm655_vm3, %v2034_v0 }
 0x263   : > { %5351 = vmatmul.mubr.msk.f32.gmra.mxu0 %vm655_vm3, %v6340_v9 }
 0x264   : > { %5369 = vmatprep.mubr.msk.f32.mxu0 %vm655_vm3, %v1884_v62 }
 0x267   : > { %5370 = vmatmul.mubr.msk.f32.vlgmr.msra.gmra.mxu0 %vm655_vm3, %v1885_v1 }
 0x268   : > { %5372 = vmatprep.mubr.msk.f32.mxu0 %vm655_vm3, %v1886_v2  ;;  %5396 = vmatpush3.msra.mxu0 %v2984_v20 }
 0x269   : > { %5423 = vmatprep.subr.mxu0 %v6388_v35 }
 0x26b   : > { %5373 = vmatmul.mubr.msk.f32.gmra.mxu0 %vm655_vm3, %v1887_v3 }
 0x26c   : > { %5375 = vmatprep.mubr.msk.f32.mxu0 %vm655_vm3, %v1888_v4 }
 0x26f   : > { %5376 = vmatmul.mubr.msk.f32.gmra.mxu0 %vm655_vm3, %v1889_v33 }
 0x270   : > { %5378 = vmatprep.mubr.msk.f32.mxu0 %vm655_vm3, %v2324_v6 }
 0x273   : > { %5379 = vmatmul.mubr.msk.f32.gmra.mxu0 %vm655_vm3, %v6351_v10 }
 0x274   : > { %5397 = vmatprep.mubr.msk.f32.mxu0 %vm655_vm3, %v6182_v21 }
 0x2c6   : > { %v5245_v11 = vpop.f32.mrf.mxu1 }
 0x2c8   : > { %v1551_v41 = vpop.f32.mrf.mxu1 }
 0x2ca   : > { %v5248_v12 = vpop.f32.mrf.mxu1 }
 0x2cc   : > { %v1561_v22 = vpop.f32.mrf.mxu1 }
 0x2ce   : > { %v5251_v37 = vpop.f32.mrf.mxu1 }
 0x2d0   : > { %v1571_v14 = vpop.f32.mrf.mxu1 }
 0x2d2   : > { %v5254_v18 = vpop.f32.mrf.mxu1 }
 0x2d4   : > { %v1581_v24 = vpop.f32.mrf.mxu1 }
 0x2d7   : > { %v5231_v16 = vpop.f32.mrf.mxu0 }
 0x2d8   : > { %v6357_v15 = vadd.f32 %v5245_v11, %v5231_v16 }
 0x2d9   : > { %v1422_v49 = vpop.f32.mrf.mxu0 }
 0x2da   : > { %6805 = vst [vmem:[#allocation16_spill] sm:$0xff] %v6357_v15  ;;  %v6365_v21 = vadd.f32 %v1551_v41, %v1422_v49 }
 0x2db   : > { %v5234_v45 = vpop.f32.mrf.mxu0 }
 0x2dc   : > { %6806 = vst [vmem:[#allocation17_spill] sm:$0xff] %v6365_v21  ;;  %v6367_v26 = vadd.f32 %v5248_v12, %v5234_v45 }
 0x2dd   : > { %v1432_v54 = vpop.f32.mrf.mxu0 }
 0x2de   : > { %6807 = vst [vmem:[#allocation18_spill] sm:$0xff] %v6367_v26  ;;  %v6369_v59 = vadd.f32 %v1561_v22, %v1432_v54  ;;  %v5273_v27 = vpop.f32.mrf.mxu1 }
 0x2df   : > { %v5237_v28 = vpop.f32.mrf.mxu0 }
 0x2e0   : > { %6808 = vst [vmem:[#allocation19_spill] sm:$0xff] %v6369_v59  ;;  %v6377_v30 = vadd.f32 %v5251_v37, %v5237_v28  ;;  %v1843_v5 = vpop.f32.mrf.mxu1 }
 0x2e1   : > { %v1442_v13 = vpop.f32.mrf.mxu0 }
 0x2e2   : > { %6810 = vst [vmem:[#allocation21_spill] sm:$0xff] %v6377_v30  ;;  %v6379_v31 = vadd.f32 %v1571_v14, %v1442_v13  ;;  %v5276_v32 = vpop.f32.mrf.mxu1 }
 0x2e3   : > { %v5240_v34 = vpop.f32.mrf.mxu0 }
 0x2e4   : > { %6811 = vst [vmem:[#allocation22_spill] sm:$0xff] %v6379_v31  ;;  %v6381_v36 = vadd.f32 %v5254_v18, %v5240_v34  ;;  %v1853_v23 = vpop.f32.mrf.mxu1 }
 0x2e5   : > { %v1452_v17 = vpop.f32.mrf.mxu0 }
 0x2e6   : > { %6812 = vst [vmem:[#allocation23_spill] sm:$0xff] %v6381_v36  ;;  %v6383_v25 = vadd.f32 %v1581_v24, %v1452_v17  ;;  %v5279_v38 = vpop.f32.mrf.mxu1 }
 0x2e7   : > { %v5259_v39 = vpop.f32.mrf.mxu0 }
 0x2e8   : > { %6813 = vst [vmem:[#allocation24_spill] sm:$0xff] %v6383_v25  ;;  %v1863_v40 = vpop.f32.mrf.mxu1  ;;  %v1849_v13 = vadd.f32 %v5273_v27, %v5259_v39 }
 0x2e9   : > { %v1714_v42 = vpop.f32.mrf.mxu0 }
 0x2ea   : > { %v5282_v43 = vpop.f32.mrf.mxu1  ;;  %v1844_v17 = vadd.f32 %v1843_v5, %v1714_v42 }
 0x2eb   : > { %v5262_v44 = vpop.f32.mrf.mxu0 }
 0x2ec   : > { %v6391_v46 = vpop.f32.mrf.mxu1  ;;  %v1859_v30 = vadd.f32 %v5276_v32, %v5262_v44 }
 0x2ed   : > { %v1724_v47 = vpop.f32.mrf.mxu0 }
 0x2ee   : > { %v5301_v48 = vpop.f32.mrf.mxu1  ;;  %v1854_v21 = vadd.f32 %v1853_v23, %v1724_v47 }
 0x2ef   : > { %v5265_v50 = vpop.f32.mrf.mxu0 }
 0x2f0   : > { %v2125_v51 = vpop.f32.mrf.mxu1 }
 0x2f1   : > { %v1734_v53 = vpop.f32.mrf.mxu0 }
 0x2f2   : > { %v5304_v55 = vpop.f32.mrf.mxu1 }
 0x2f3   : > { %v5268_v52 = vpop.f32.mrf.mxu0 }
 0x2f4   : > { %v2135_v56 = vpop.f32.mrf.mxu1  ;;  %v1879_v42 = vadd.f32 %v5282_v43, %v5268_v52 }
 0x2f5   : > { %v1744_v60 = vpop.f32.mrf.mxu0 }
 0x2f6   : > { %v6393_v61 = vpop.f32.mrf.mxu1 }
 0x2f7   : > { %v5287_v57 = vpop.f32.mrf.mxu0 }
 0x2f8   : > { %v6395_v62 = vpop.f32.mrf.mxu1  ;;  %v2020_v25 = vadd.f32 %v5287_v57, %v1849_v13 }
 0x2f9   : > { %v1980_v0 = vpop.f32.mrf.mxu0 }
 0x2fa   : > { %v6397_v1 = vpop.f32.mrf.mxu1  ;;  %v2019_v59 = vadd.f32 %v1980_v0, %v1844_v17  ;;  %v2165_v10 = vadd.f32 %v5301_v48, %v2020_v25 }
 0x2fb   : > { %v5290_v2 = vpop.f32.mrf.mxu0 }
 0x2fc   : > { %v6399_v3 = vpop.f32.mrf.mxu1  ;;  %v2022_v15 = vadd.f32 %v5290_v2, %v1859_v30  ;;  %v2164_v63 = vadd.f32 %v2125_v51, %v2019_v59  ;;  %v1874_v30 = vadd.f32 %v6391_v46, %v1744_v60 }
 0x2fd   : > { %v1990_v4 = vpop.f32.mrf.mxu0 }
 0x2fe   : > { %v5329_v33 = vpop.f32.mrf.mxu1  ;;  %v2021_v58 = vadd.f32 %v1990_v4, %v1854_v21  ;;  %v2167_v39 = vadd.f32 %v5304_v55, %v2022_v15 }
 0x2ff   : > { %v5293_v29 = vpop.f32.mrf.mxu0 }
 0x300   : > { %v2415_v6 = vpop.f32.mrf.mxu1  ;;  %v2166_v0 = vadd.f32 %v2135_v56, %v2021_v58 }
 0x301   : > { %v2000_v7 = vpop.f32.mrf.mxu0 }
 0x302   : > { %v5332_v11 = vpop.f32.mrf.mxu1 }
 0x303   : > { %v5296_v41 = vpop.f32.mrf.mxu0 }
 0x304   : > { %v2425_v12 = vpop.f32.mrf.mxu1  ;;  %v2026_v25 = vadd.f32 %v5296_v41, %v1879_v42 }
 0x305   : > { %v2010_v22 = vpop.f32.mrf.mxu0 }
 0x306   : > { %v6401_v37 = vpop.f32.mrf.mxu1  ;;  %v2171_v58 = vadd.f32 %v6397_v1, %v2026_v25 }
 0x307   : > { %v5315_v14 = vpop.f32.mrf.mxu0 }
 0x308   : > { %v6403_v18 = vpop.f32.mrf.mxu1  ;;  %v2310_v35 = vadd.f32 %v5315_v14, %v2165_v10 }
 0x309   : > { %v2270_v16 = vpop.f32.mrf.mxu0  ;;  %6815 = vst [vmem:[#allocation26_spill] sm:$0xff] %v6403_v18 }
 0x30a   : > { %v6405_v49 = vpop.f32.mrf.mxu1  ;;  %v2309_v27 = vadd.f32 %v2270_v16, %v2164_v63  ;;  %v2455_v23 = vadd.f32 %v5329_v33, %v2310_v35 }
 0x30b   : > { %v5318_v19 = vpop.f32.mrf.mxu0  ;;  %6816 = vst [vmem:[#allocation27_spill] sm:$0xff] %v6405_v49  ;;  %v1869_v49 = vadd.f32 %v5279_v38, %v5265_v50 }
 0x30c   : > { %v6407_v54 = vpop.f32.mrf.mxu1  ;;  %v2312_v44 = vadd.f32 %v5318_v19, %v2167_v39  ;;  %v2454_v38 = vadd.f32 %v2415_v6, %v2309_v27 }
 0x30d   : > { %v2280_v20 = vpop.f32.mrf.mxu0  ;;  %6817 = vst [vmem:[#allocation28_spill] sm:$0xff] %v6407_v54  ;;  %v1864_v54 = vadd.f32 %v1863_v40, %v1734_v53  ;;  %v2024_v57 = vadd.f32 %v5293_v29, %v1869_v49  ;;  %v2025_v40 = vadd.f32 %v2010_v22, %v1874_v30 }
 0x30e   : > { %v5357_v36 = vpop.f32.mrf.mxu1  ;;  %v2311_v21 = vadd.f32 %v2280_v20, %v2166_v0  ;;  %v2457_v50 = vadd.f32 %v5332_v11, %v2312_v44 }
 0x30f   : > { %v5321_v45 = vpop.f32.mrf.mxu0  ;;  %v2023_v13 = vadd.f32 %v2000_v7, %v1864_v54  ;;  %v2169_v63 = vadd.f32 %v6393_v61, %v2024_v57  ;;  %v4834_v61 = vld [vmem:[%s6749_s11] ss:$0 sm:$0xff] }
 0x310   : > { %v2706_v8 = vpop.f32.mrf.mxu1  ;;  %v2456_v52 = vadd.f32 %v2425_v12, %v2311_v21  ;;  %v6818_v1 = vld [vmem:[#allocation26_spill] sm:$0xff] }
 0x311   : > { %v2290_v24 = vpop.f32.mrf.mxu0  ;;  %v2168_v15 = vadd.f32 %v6395_v62, %v2023_v13  ;;  %v2314_v51 = vadd.f32 %v5321_v45, %v2169_v63 }
 0x312   : > { %v5360_v5 = vpop.f32.mrf.mxu1  ;;  %v6819_v14 = vld [vmem:[#allocation27_spill] sm:$0xff] }
 0x313   : > { %v5324_v28 = vpop.f32.mrf.mxu0  ;;  %v2313_v53 = vadd.f32 %v2290_v24, %v2168_v15  ;;  %v2459_v29 = vadd.f32 %v6401_v37, %v2314_v51 }
 0x314   : > { %v2716_v10 = vpop.f32.mrf.mxu1  ;;  %v2316_v60 = vadd.f32 %v5324_v28, %v2171_v58  ;;  %v6820_v24 = vld [vmem:[#allocation28_spill] sm:$0xff] }
 0x315   : > { %v2300_v34 = vpop.f32.mrf.mxu0  ;;  %v2458_v6 = vadd.f32 %v6818_v1, %v2313_v53 }
 0x316   : > { %v5363_v46 = vpop.f32.mrf.mxu1  ;;  %v2461_v16 = vadd.f32 %v6819_v14, %v2316_v60 }
 0x317   : > { %v5343_v31 = vpop.f32.mrf.mxu0 }
 0x318   : > { %v2601_v59 = vadd.f32 %v5343_v31, %v2455_v23  ;;  %v2170_v31 = vadd.f32 %v6399_v3, %v2025_v40  ;;  %v2726_v7 = vpop.f32.mrf.mxu1 }
 0x319   : > { %v2561_v26 = vpop.f32.mrf.mxu0 }
 0x31a   : > { %v2600_v48 = vadd.f32 %v2561_v26, %v2454_v38  ;;  %v2746_v56 = vadd.f32 %v5357_v36, %v2601_v59  ;;  %v2315_v33 = vadd.f32 %v2300_v34, %v2170_v31 }
 0x31b   : > { %v5346_v9 = vpop.f32.mrf.mxu0 }
 0x31c   : > { %v2603_v55 = vadd.f32 %v5346_v9, %v2457_v50  ;;  %v2745_v4 = vadd.f32 %v2706_v8, %v2600_v48  ;;  %v4835_v9 = vld [vmem:[%s6750_s12] ss:$0 sm:$0xff]  ;;  %v5366_v8 = vpop.f32.mrf.mxu1  ;;  %v2460_v54 = vadd.f32 %v6820_v24, %v2315_v33 }
 0x31d   : > { %v2571_v18 = vpop.f32.mrf.mxu0 }
 0x31e   : > { %v2602_v62 = vadd.f32 %v2571_v18, %v2456_v52  ;;  %v2748_v41 = vadd.f32 %v5360_v5, %v2603_v55 }
 0x31f   : > { %v5349_v32 = vpop.f32.mrf.mxu0 }
 0x320   : > { %v2605_v12 = vadd.f32 %v5349_v32, %v2459_v29  ;;  %v2747_v49 = vadd.f32 %v2716_v10, %v2602_v62  ;;  %v2736_v32 = vpop.f32.mrf.mxu1 }
 0x321   : > { %v2581_v47 = vpop.f32.mrf.mxu0 }
 0x322   : > { %v2604_v22 = vadd.f32 %v2581_v47, %v2458_v6  ;;  %v2750_v42 = vadd.f32 %v5363_v46, %v2605_v12 }
 0x323   : > { %v5352_v43 = vpop.f32.mrf.mxu0 }
 0x324   : > { %v2607_v45 = vadd.f32 %v5352_v43, %v2461_v16  ;;  %v2749_v13 = vadd.f32 %v2726_v7, %v2604_v22 }
 0x325   : > { %v2591_v35 = vpop.f32.mrf.mxu0 }
 0x326   : > { %v2606_v5 = vadd.f32 %v2591_v35, %v2460_v54  ;;  %v2752_v30 = vadd.f32 %v5366_v8, %v2607_v45 }
 0x327   : > { %v5371_v2 = vpop.f32.mrf.mxu0 }
 0x328   : > { %v2891_v26 = vadd.f32 %v5371_v2, %v2746_v56  ;;  %v2751_v38 = vadd.f32 %v2736_v32, %v2606_v5  ;;  %v6821_v32 = vld [vmem:[#allocation20_spill] sm:$0xff] }
 0x329   : > { %v2851_v36 = vpop.f32.mrf.mxu0 }
 0x32a   : > { %v2906_v3 = vmul.f32 %v4834_v61, %v2891_v26  ;;  %v2890_v11 = vadd.f32 %v2851_v36, %v2745_v4 }
 0x32b   : > { %v5374_v18 = vpop.f32.mrf.mxu0 }
 0x32c   : > { %v6423_v19 = vadd.f32 %v4835_v9, %v2906_v3  ;;  %v2905_v37 = vmul.f32 %v4834_v61, %v2890_v11  ;;  %v2893_v20 = vadd.f32 %v5374_v18, %v2748_v41 }
 0x32d   : > { %v2861_v28 = vpop.f32.mrf.mxu0 }
 0x32e   : > { %v4837_v34 = vmul.f32 -1.442695, %v6423_v19  ;;  %v6427_v17 = vadd.f32 %v4835_v9, %v2905_v37  ;;  %v2908_v27 = vmul.f32 %v4834_v61, %v2893_v20  ;;  %v2892_v39 = vadd.f32 %v2861_v28, %v2747_v49 }
 0x32f   : > { %v5377_v57 = vpop.f32.mrf.mxu0 }
 0x330   : > { %5659 = vpow2.f32 %v4837_v34  ;;  %v4836_v44 = vmul.f32 -1.442695, %v6427_v17  ;;  %v6430_v0 = vadd.f32 %v4835_v9, %v2908_v27  ;;  %v2907_v23 = vmul.f32 %v4834_v61, %v2892_v39 }
 0x331   : > { %v2895_v25 = vadd.f32 %v5377_v57, %v2750_v42  ;;  %v2871_v47 = vpop.f32.mrf.mxu0  ;;  %v2988_v42 = vld [vmem:[%s6751_s13 + $0x20] sm:$0xff]  ;;  %v2989_v57 = vld [vmem:[%s6751_s13 + $0x28] sm:$0xff] }
 0x332   : > { %5661 = vpow2.f32 %v4836_v44  ;;  %v4839_v21 = vmul.f32 -1.442695, %v6430_v0  ;;  %v2922_v10 = vadd.f32 %v4835_v9, %v2907_v23  ;;  %v2894_v59 = vadd.f32 %v2871_v47, %v2749_v13  ;;  %v6822_v23 = vld [vmem:[#allocation25_spill] sm:$0xff] }
 0x333   : > { %v2910_v40 = vmul.f32 %v4834_v61, %v2895_v25  ;;  %v5380_v63 = vpop.f32.mrf.mxu0 }
 0x334   : > { %5663 = vpow2.f32 %v4839_v21  ;;  %v4838_v15 = vmul.f32 -1.442695, %v2922_v10  ;;  %v2909_v43 = vmul.f32 %v4834_v61, %v2894_v59  ;;  %v2897_v48 = vadd.f32 %v5380_v63, %v2752_v30 }
 0x335   : > { %v2925_v50 = vadd.f32 %v4835_v9, %v2910_v40  ;;  %v2881_v51 = vpop.f32.mrf.mxu0 }
 0x336   : > { %5665 = vpow2.f32 %v4838_v15  ;;  %v2924_v53 = vadd.f32 %v4835_v9, %v2909_v43  ;;  %v2912_v58 = vmul.f32 %v4834_v61, %v2897_v48  ;;  %v2896_v35 = vadd.f32 %v2881_v51, %v2751_v38  ;;  %v6823_v43 = vld [vmem:[#allocation12_spill] sm:$0xff] }
 0x337   : > { %v4841_v46 = vmul.f32 -1.442695, %v2925_v50  ;;  %v2990_v51 = vld [vmem:[%s6751_s13 + $0x30] sm:$0xff] }
 0x338   : > { %v4840_v55 = vmul.f32 -1.442695, %v2924_v53  ;;  %v2927_v52 = vadd.f32 %v4835_v9, %v2912_v58  ;;  %v2911_v56 = vmul.f32 %v4834_v61, %v2896_v35 }
 0x339   : > { %5667 = vpow2.f32 %v4841_v46 }
 0x33a   : > { %5669 = vpow2.f32 %v4840_v55  ;;  %v4843_v60 = vmul.f32 -1.442695, %v2927_v52  ;;  %v2926_v31 = vadd.f32 %v4835_v9, %v2911_v56 }
 0x33c   : > { %5671 = vpow2.f32 %v4843_v60  ;;  %v4842_v2 = vmul.f32 -1.442695, %v2926_v31  ;;  %v2992_v60 = vld [vmem:[%s6751_s13 + $0x40] sm:$0xff] }
 0x33d   : > { %v5660_v62 = vpop.eup %5659 }
 0x33e   : > { %v2953_v26 = vadd.f32 1.0, %v5660_v62  ;;  %5673 = vpow2.f32 %v4842_v2  ;;  %v6824_v62 = vld [vmem:[#allocation14_spill] sm:$0xff] }
 0x33f   : > { %v5662_v4 = vpop.eup %5661 }
 0x340   : > { %5675 = vrcp.f32 %v2953_v26  ;;  %v2952_v33 = vadd.f32 1.0, %v5662_v4  ;;  %v6825_v26 = vld [vmem:[#allocation13_spill] sm:$0xff]  ;;  %v6826_v4 = vld [vmem:[#allocation15_spill] sm:$0xff] }
 0x341   : > { %v5664_v29 = vpop.eup %5663 }
 0x342   : > { %5677 = vrcp.f32 %v2952_v33  ;;  %v2955_v1 = vadd.f32 1.0, %v5664_v29  ;;  %v4376_v33 = vld [vmem:[%s6756_s18] sm:$0xff] }
 0x343   : > { %v5666_v6 = vpop.eup %5665 }
 0x344   : > { %5679 = vrcp.f32 %v2955_v1  ;;  %v2954_v36 = vadd.f32 1.0, %v5666_v6 }
 0x346   : > { %v5668_v7 = vpop.eup %5667  ;;  %5681 = vrcp.f32 %v2954_v36 }
 0x347   : > { %v5670_v61 = vpop.eup %5669  ;;  %v2957_v3 = vadd.f32 1.0, %v5668_v7 }
 0x348   : > { %v2956_v11 = vadd.f32 1.0, %v5670_v61 }
 0x349   : > { %v5672_v9 = vpop.eup %5671  ;;  %5683 = vrcp.f32 %v2957_v3 }
 0x34a   : > { %5685 = vrcp.f32 %v2956_v11  ;;  %v2959_v41 = vadd.f32 1.0, %v5672_v9 }
 0x34b   : > { %v5674_v12 = vpop.eup %5673 }
 0x34c   : > { %5687 = vrcp.f32 %v2959_v41  ;;  %v2958_v22 = vadd.f32 1.0, %v5674_v12 }
 0x34d   : > { %v5676_v14 = vpop.eup %5675 }
 0x34e   : > { %v2977_v16 = vmul.f32 %v5676_v14, %v6423_v19  ;;  %5689 = vrcp.f32 %v2958_v22 }
 0x34f   : > { %v5678_v18 = vpop.eup %5677 }
 0x350   : > { %2994 = vst.msk [vmem:[#allocation2 + $0x38] sm:$0xff] %vm655_vm3, %v2977_v16  ;;  %v2976_v8 = vmul.f32 %v5678_v18, %v6427_v17 }
 0x351   : > { %v5680_v37 = vpop.eup %5679 }
 0x352   : > { %2993 = vst.msk [vmem:[#allocation2 + $0x20] sm:$0xff] %vm655_vm3, %v2976_v8  ;;  %v2979_v20 = vmul.f32 %v5680_v37, %v6430_v0 }
 0x353   : > { %v5682_v49 = vpop.eup %5681 }
 0x354   : > { %2996 = vst.msk [vmem:[#allocation2 + $0x68] sm:$0xff] %vm655_vm3, %v2979_v20  ;;  %v2978_v45 = vmul.f32 %v5682_v49, %v2922_v10 }
 0x356   : > { %v5684_v24 = vpop.eup %5683  ;;  %2995 = vst.msk [vmem:[#allocation2 + $0x50] sm:$0xff] %vm655_vm3, %v2978_v45 }
 0x357   : > { %v5686_v54 = vpop.eup %5685  ;;  %v2981_v19 = vmul.f32 %v5684_v24, %v2925_v50  ;;  %v6447_v5 = vld [vmem:[#allocation2 + $0x38] sm:$0xff] }
 0x358   : > { %v2980_v28 = vmul.f32 %v5686_v54, %v2924_v53  ;;  %v6458_v44 = vld [vmem:[#allocation2 + $0x37] sm:$0xff] }
 0x359   : > { %v5688_v34 = vpop.eup %5687  ;;  %2998 = vst.msk [vmem:[#allocation2 + $0x98] sm:$0xff] %vm655_vm3, %v2981_v19  ;;  %v6441_v27 = vld [vmem:[#allocation2 + $0x20] sm:$0xff]  ;;  %v2991_v53 = vld [vmem:[%s6751_s13 + $0x38] sm:$0xff] }
 0x35a   : > { %v3002_v17 = vld [vmem:[#allocation2 + $0x1f] sm:$0xff]  ;;  %2997 = vst.msk [vmem:[#allocation2 + $0x80] sm:$0xff] %vm655_vm3, %v2980_v28  ;;  %v2983_v39 = vmul.f32 %v5688_v34, %v2927_v52  ;;  %5384 = vmatmul.mubr.msk.f32.vlgmr.msra.gmra.mxu1 %vm655_vm3, %v6441_v27 }
 0x35b   : > { %5398 = vmatmul.mubr.msk.f32.vlgmr.msra.gmra.mxu0 %vm655_vm3, %v3002_v17  ;;  %v5690_v13 = vpop.eup %5689  ;;  %5410 = vmatpush3.msra.mxu1 %v6821_v32  ;;  %v6473_v47 = vld [vmem:[#allocation2 + $0x68] sm:$0xff]  ;;  %v6511_v50 = vld [vmem:[#allocation2 + $0x39] sm:$0xff] }
 0x35c   : > { %5386 = vmatprep.mubr.msk.f32.mxu1 %vm655_vm3, %v6447_v5  ;;  %3000 = vst.msk [vmem:[#allocation2 + $0xc8] sm:$0xff] %vm655_vm3, %v2983_v39  ;;  %v2982_v0 = vmul.f32 %v5690_v13, %v2926_v31  ;;  %5400 = vmatprep.mubr.msk.f32.mxu0 %vm655_vm3, %v6458_v44  ;;  %v6475_v21 = vld [vmem:[#allocation2 + $0x67] sm:$0xff] }
 0x35d   : > { %5424 = vmatpush3.msra.mxu0 %v6822_v23  ;;  %v6464_v30 = vld [vmem:[#allocation2 + $0x50] sm:$0xff]  ;;  %5437 = vmatprep.subr.mxu1 %v2988_v42  ;;  %v3276_v48 = vld [vmem:[#allocation2 + $0x21] sm:$0xff] }
 0x35e   : > { %v6466_v25 = vld [vmem:[#allocation2 + $0x4f] sm:$0xff]  ;;  %5451 = vmatprep.subr.mxu0 %v2989_v57  ;;  %2999 = vst.msk [vmem:[#allocation2 + $0xb0] sm:$0xff] %vm655_vm3, %v2982_v0  ;;  %5387 = vmatmul.mubr.msk.f32.gmra.mxu1 %vm655_vm3, %v6464_v30 }
 0x35f   : > { %5401 = vmatmul.mubr.msk.f32.gmra.mxu0 %vm655_vm3, %v6466_v25  ;;  %5389 = vmatprep.mubr.msk.f32.mxu1 %vm655_vm3, %v6473_v47  ;;  %v3278_v58 = vld [vmem:[#allocation2 + $0x51] sm:$0xff]  ;;  %v3279_v35 = vld [vmem:[#allocation2 + $0x69] sm:$0xff] }
 0x360   : > { %5403 = vmatprep.mubr.msk.f32.mxu0 %vm655_vm3, %v6475_v21  ;;  %v6489_v38 = vld [vmem:[#allocation2 + $0x98] sm:$0xff] }
 0x361   : > { %v6481_v10 = vld [vmem:[#allocation2 + $0x80] sm:$0xff]  ;;  %v6491_v40 = vld [vmem:[#allocation2 + $0x97] sm:$0xff] }
 0x362   : > { %v6483_v59 = vld [vmem:[#allocation2 + $0x7f] sm:$0xff]  ;;  %5390 = vmatmul.mubr.msk.f32.gmra.mxu1 %vm655_vm3, %v6481_v10 }
 0x363   : > { %5404 = vmatmul.mubr.msk.f32.gmra.mxu0 %vm655_vm3, %v6483_v59  ;;  %5392 = vmatprep.mubr.msk.f32.mxu1 %vm655_vm3, %v6489_v38  ;;  %v3280_v46 = vld [vmem:[#allocation2 + $0x81] sm:$0xff]  ;;  %v3281_v55 = vld [vmem:[#allocation2 + $0x99] sm:$0xff]  ;;  %v3717_v2 = vld [vmem:[#allocation2 + $0xc9] sm:$0xff] }
 0x364   : > { %5406 = vmatprep.mubr.msk.f32.mxu0 %vm655_vm3, %v6491_v40  ;;  %v3427_v56 = vld [vmem:[#allocation2 + $0xc7] sm:$0xff] }
 0x365   : > { %v6497_v63 = vld [vmem:[#allocation2 + $0xb0] sm:$0xff]  ;;  %v3572_v31 = vld [vmem:[#allocation2 + $0xc8] sm:$0xff] }
 0x366   : > { %v6499_v15 = vld [vmem:[#allocation2 + $0xaf] sm:$0xff]  ;;  %5393 = vmatmul.mubr.msk.f32.gmra.mxu1 %vm655_vm3, %v6497_v63 }
 0x367   : > { %5407 = vmatmul.mubr.msk.f32.gmra.mxu0 %vm655_vm3, %v6499_v15  ;;  %5411 = vmatprep.mubr.msk.f32.mxu1 %vm655_vm3, %v6823_v43  ;;  %v3282_v52 = vld [vmem:[#allocation2 + $0xb1] sm:$0xff] }
 0x368   : > { %5425 = vmatprep.mubr.msk.f32.mxu0 %vm655_vm3, %v3002_v17 }
 0x36a   : > { %5412 = vmatmul.mubr.msk.f32.vlgmr.msra.gmra.mxu1 %vm655_vm3, %v3276_v48 }
 0x36b   : > { %5426 = vmatmul.mubr.msk.f32.vlgmr.msra.gmra.mxu0 %vm655_vm3, %v6458_v44  ;;  %5438 = vmatpush3.msra.mxu1 %v2988_v42 }
 0x36c   : > { %5414 = vmatprep.mubr.msk.f32.mxu1 %vm655_vm3, %v6511_v50  ;;  %5428 = vmatprep.mubr.msk.f32.mxu0 %vm655_vm3, %v6466_v25 }
 0x36d   : > { %5452 = vmatpush3.msra.mxu0 %v2989_v57  ;;  %5465 = vmatprep.subr.mxu1 %v2990_v51 }
 0x36e   : > { %5479 = vmatprep.subr.mxu0 %v2991_v53  ;;  %5415 = vmatmul.mubr.msk.f32.gmra.mxu1 %vm655_vm3, %v3278_v58 }
 0x36f   : > { %5429 = vmatmul.mubr.msk.f32.gmra.mxu0 %vm655_vm3, %v6475_v21  ;;  %5417 = vmatprep.mubr.msk.f32.mxu1 %vm655_vm3, %v3279_v35 }
 0x370   : > { %5431 = vmatprep.mubr.msk.f32.mxu0 %vm655_vm3, %v6483_v59 }
 0x372   : > { %5418 = vmatmul.mubr.msk.f32.gmra.mxu1 %vm655_vm3, %v3280_v46 }
 0x373   : > { %5432 = vmatmul.mubr.msk.f32.gmra.mxu0 %vm655_vm3, %v6491_v40  ;;  %5420 = vmatprep.mubr.msk.f32.mxu1 %vm655_vm3, %v3281_v55 }
 0x374   : > { %5434 = vmatprep.mubr.msk.f32.mxu0 %vm655_vm3, %v6499_v15 }
 0x376   : > { %5421 = vmatmul.mubr.msk.f32.gmra.mxu1 %vm655_vm3, %v3282_v52 }
 0x377   : > { %5435 = vmatmul.mubr.msk.f32.gmra.mxu0 %vm655_vm3, %v3427_v56  ;;  %5439 = vmatprep.mubr.msk.f32.mxu1 %vm655_vm3, %v6441_v27 }
 0x378   : > { %5453 = vmatprep.mubr.msk.f32.mxu0 %vm655_vm3, %v3276_v48 }
 0x37a   : > { %5440 = vmatmul.mubr.msk.f32.vlgmr.msra.gmra.mxu1 %vm655_vm3, %v6447_v5 }
 0x37b   : > { %5454 = vmatmul.mubr.msk.f32.vlgmr.msra.gmra.mxu0 %vm655_vm3, %v6511_v50  ;;  %5466 = vmatpush3.msra.mxu1 %v2990_v51 }
 0x37c   : > { %5442 = vmatprep.mubr.msk.f32.mxu1 %vm655_vm3, %v6464_v30  ;;  %5456 = vmatprep.mubr.msk.f32.mxu0 %vm655_vm3, %v3278_v58 }
 0x37d   : > { %5480 = vmatpush3.msra.mxu0 %v2991_v53  ;;  %5493 = vmatprep.subr.mxu1 %v2992_v60 }
 0x37e   : > { %5443 = vmatmul.mubr.msk.f32.gmra.mxu1 %vm655_vm3, %v6473_v47  ;;  %5507 = vmatprep.subr.mxu0 %v4376_v33 }
 0x37f   : > { %5457 = vmatmul.mubr.msk.f32.gmra.mxu0 %vm655_vm3, %v3279_v35  ;;  %5445 = vmatprep.mubr.msk.f32.mxu1 %vm655_vm3, %v6481_v10 }
 0x380   : > { %5459 = vmatprep.mubr.msk.f32.mxu0 %vm655_vm3, %v3280_v46 }
 0x382   : > { %5446 = vmatmul.mubr.msk.f32.gmra.mxu1 %vm655_vm3, %v6489_v38 }
 0x383   : > { %5460 = vmatmul.mubr.msk.f32.gmra.mxu0 %vm655_vm3, %v3281_v55  ;;  %5448 = vmatprep.mubr.msk.f32.mxu1 %vm655_vm3, %v6497_v63 }
 0x384   : > { %5462 = vmatprep.mubr.msk.f32.mxu0 %vm655_vm3, %v3282_v52 }
 0x386   : > { %5449 = vmatmul.mubr.msk.f32.gmra.mxu1 %vm655_vm3, %v3572_v31 }
 0x387   : > { %5463 = vmatmul.mubr.msk.f32.gmra.mxu0 %vm655_vm3, %v3717_v2  ;;  %5467 = vmatprep.mubr.msk.f32.mxu1 %vm655_vm3, %v6458_v44 }
 0x388   : > { %5481 = vmatprep.mubr.msk.f32.mxu0 %vm655_vm3, %v6447_v5 }
 0x38a   : > { %5468 = vmatmul.mubr.msk.f32.vlgmr.msra.gmra.mxu1 %vm655_vm3, %v6466_v25 }
 0x38b   : > { %5482 = vmatmul.mubr.msk.f32.vlgmr.msra.gmra.mxu0 %vm655_vm3, %v6464_v30  ;;  %5494 = vmatpush3.msra.mxu1 %v2992_v60 }
 0x38c   : > { %5470 = vmatprep.mubr.msk.f32.mxu1 %vm655_vm3, %v6475_v21  ;;  %5484 = vmatprep.mubr.msk.f32.mxu0 %vm655_vm3, %v6473_v47 }
 0x38d   : > { %5508 = vmatpush3.msra.mxu0 %v4376_v33 }
 0x38e   : > { %5471 = vmatmul.mubr.msk.f32.gmra.mxu1 %vm655_vm3, %v6483_v59 }
 0x38f   : > { %5485 = vmatmul.mubr.msk.f32.gmra.mxu0 %vm655_vm3, %v6481_v10  ;;  %5473 = vmatprep.mubr.msk.f32.mxu1 %vm655_vm3, %v6491_v40 }
 0x390   : > { %5487 = vmatprep.mubr.msk.f32.mxu0 %vm655_vm3, %v6489_v38 }
 0x392   : > { %5474 = vmatmul.mubr.msk.f32.gmra.mxu1 %vm655_vm3, %v6499_v15 }
 0x393   : > { %5488 = vmatmul.mubr.msk.f32.gmra.mxu0 %vm655_vm3, %v6497_v63  ;;  %5476 = vmatprep.mubr.msk.f32.mxu1 %vm655_vm3, %v3427_v56 }
 0x394   : > { %5490 = vmatprep.mubr.msk.f32.mxu0 %vm655_vm3, %v3572_v31 }
 0x396   : > { %5477 = vmatmul.mubr.msk.f32.gmra.mxu1 %vm655_vm3, %v6824_v62 }
 0x397   : > { %5491 = vmatmul.mubr.msk.f32.gmra.mxu0 %vm655_vm3, %v6825_v26  ;;  %5495 = vmatprep.mubr.msk.f32.mxu1 %vm655_vm3, %v6511_v50 }
 0x39a   : > { %5496 = vmatmul.mubr.msk.f32.vlgmr.msra.gmra.mxu1 %vm655_vm3, %v3278_v58 }
 0x39b   : > { %5498 = vmatprep.mubr.msk.f32.mxu1 %vm655_vm3, %v3279_v35 }
 0x39e   : > { %5499 = vmatmul.mubr.msk.f32.gmra.mxu1 %vm655_vm3, %v3280_v46 }
 0x39f   : > { %5501 = vmatprep.mubr.msk.f32.mxu1 %vm655_vm3, %v3281_v55 }
 0x3a2   : > { %5502 = vmatmul.mubr.msk.f32.gmra.mxu1 %vm655_vm3, %v3282_v52 }
 0x3a3   : > { %5504 = vmatprep.mubr.msk.f32.mxu1 %vm655_vm3, %v3717_v2 }
 0x3a6   : > { %5505 = vmatmul.mubr.msk.f32.gmra.mxu1 %vm655_vm3, %v6826_v4 }
 0x41a   : > { %v5385_v29 = vpop.f32.mrf.mxu1 }
 0x41b   : > { %v5399_v1 = vpop.f32.mrf.mxu0 }
 0x41c   : > { %v3107_v6 = vpop.f32.mrf.mxu1  ;;  %v3242_v43 = vadd.f32 %v5399_v1, %v5385_v29 }
 0x41d   : > { %v3236_v36 = vpop.f32.mrf.mxu0 }
 0x41e   : > { %v5388_v7 = vpop.f32.mrf.mxu1  ;;  %v3237_v51 = vadd.f32 %v3236_v36, %v3107_v6 }
 0x41f   : > { %v5402_v61 = vpop.f32.mrf.mxu0 }
 0x420   : > { %v3117_v3 = vpop.f32.mrf.mxu1  ;;  %v3252_v46 = vadd.f32 %v5402_v61, %v5388_v7 }
 0x421   : > { %v3246_v11 = vpop.f32.mrf.mxu0 }
 0x422   : > { %v5391_v9 = vpop.f32.mrf.mxu1  ;;  %v3247_v56 = vadd.f32 %v3246_v11, %v3117_v3 }
 0x423   : > { %v5405_v41 = vpop.f32.mrf.mxu0 }
 0x424   : > { %v3127_v12 = vpop.f32.mrf.mxu1 }
 0x425   : > { %v3256_v22 = vpop.f32.mrf.mxu0 }
 0x426   : > { %v5394_v14 = vpop.f32.mrf.mxu1  ;;  %v3257_v29 = vadd.f32 %v3256_v22, %v3127_v12 }
 0x427   : > { %v5408_v16 = vpop.f32.mrf.mxu0 }
 0x428   : > { %v6607_v18 = vpop.f32.mrf.mxu1  ;;  %v3272_v36 = vadd.f32 %v5408_v16, %v5394_v14 }
 0x429   : > { %v3266_v8 = vpop.f32.mrf.mxu0 }
 0x42a   : > { %v5413_v37 = vpop.f32.mrf.mxu1  ;;  %v3267_v11 = vadd.f32 %v3266_v8, %v6607_v18 }
 0x42b   : > { %v5427_v20 = vpop.f32.mrf.mxu0  ;;  %v3413_v53 = vadd.f32 %v5413_v37, %v3242_v43 }
 0x42c   : > { %v3373_v49 = vpop.f32.mrf.mxu1 }
 0x42d   : > { %v3518_v45 = vpop.f32.mrf.mxu0  ;;  %v3412_v55 = vadd.f32 %v3373_v49, %v3237_v51  ;;  %v3558_v60 = vadd.f32 %v5427_v20, %v3413_v53 }
 0x42e   : > { %v5416_v24 = vpop.f32.mrf.mxu1 }
 0x42f   : > { %v5430_v54 = vpop.f32.mrf.mxu0  ;;  %v3415_v31 = vadd.f32 %v5416_v24, %v3252_v46  ;;  %v3557_v26 = vadd.f32 %v3518_v45, %v3412_v55 }
 0x430   : > { %v3383_v19 = vpop.f32.mrf.mxu1 }
 0x431   : > { %v3528_v28 = vpop.f32.mrf.mxu0  ;;  %v3414_v4 = vadd.f32 %v3383_v19, %v3247_v56 }
 0x432   : > { %v5419_v34 = vpop.f32.mrf.mxu1 }
 0x433   : > { %v5433_v27 = vpop.f32.mrf.mxu0  ;;  %v3559_v61 = vadd.f32 %v3528_v28, %v3414_v4 }
 0x434   : > { %v3393_v17 = vpop.f32.mrf.mxu1 }
 0x435   : > { %v3538_v39 = vpop.f32.mrf.mxu0  ;;  %v3416_v43 = vadd.f32 %v3393_v17, %v3257_v29 }
 0x436   : > { %v5422_v5 = vpop.f32.mrf.mxu1 }
 0x437   : > { %v5436_v42 = vpop.f32.mrf.mxu0  ;;  %v3419_v20 = vadd.f32 %v5422_v5, %v3272_v36  ;;  %v3561_v12 = vadd.f32 %v3538_v39, %v3416_v43 }
 0x438   : > { %v3403_v57 = vpop.f32.mrf.mxu1 }
 0x439   : > { %v6609_v13 = vpop.f32.mrf.mxu0  ;;  %v3418_v22 = vadd.f32 %v3403_v57, %v3267_v11  ;;  %v3564_v16 = vadd.f32 %v5436_v42, %v3419_v20 }
 0x43a   : > { %v5441_v32 = vpop.f32.mrf.mxu1 }
 0x43b   : > { %v5455_v44 = vpop.f32.mrf.mxu0  ;;  %v3703_v33 = vadd.f32 %v5441_v32, %v3558_v60  ;;  %v3563_v8 = vadd.f32 %v6609_v13, %v3418_v22 }
 0x43c   : > { %v3663_v0 = vpop.f32.mrf.mxu1 }
 0x43d   : > { %v3808_v23 = vpop.f32.mrf.mxu0  ;;  %v3848_v49 = vadd.f32 %v5455_v44, %v3703_v33 }
 0x43e   : > { %v5444_v30 = vpop.f32.mrf.mxu1 }
 0x43f   : > { %v5458_v25 = vpop.f32.mrf.mxu0 }
 0x440   : > { %v3673_v47 = vpop.f32.mrf.mxu1 }
 0x441   : > { %v3818_v21 = vpop.f32.mrf.mxu0  ;;  %v3704_v19 = vadd.f32 %v3673_v47, %v3559_v61 }
 0x442   : > { %v5447_v10 = vpop.f32.mrf.mxu1 }
 0x443   : > { %v6611_v59 = vpop.f32.mrf.mxu0  ;;  %v3849_v44 = vadd.f32 %v3818_v21, %v3704_v19  ;;  %v4917_v21 = vld [vmem:[%s6753_s15] ss:$0 sm:$0xff] }
 0x444   : > { %v3683_v38 = vpop.f32.mrf.mxu1 }
 0x445   : > { %v6613_v40 = vpop.f32.mrf.mxu0  ;;  %v3706_v17 = vadd.f32 %v3683_v38, %v3561_v12 }
 0x446   : > { %6827 = vst [vmem:[#allocation26_spill] sm:$0xff] %v6613_v40  ;;  %v5450_v63 = vpop.f32.mrf.mxu1  ;;  %v3560_v40 = vadd.f32 %v5430_v54, %v3415_v31 }
 0x447   : > { %v6615_v15 = vpop.f32.mrf.mxu0  ;;  %v3709_v5 = vadd.f32 %v5450_v63, %v3564_v16 }
 0x448   : > { %6828 = vst [vmem:[#allocation27_spill] sm:$0xff] %v6615_v15  ;;  %v3693_v48 = vpop.f32.mrf.mxu1  ;;  %v3262_v15 = vadd.f32 %v5405_v41, %v5391_v9  ;;  %v3705_v3 = vadd.f32 %v5444_v30, %v3560_v40 }
 0x449   : > { %v6617_v50 = vpop.f32.mrf.mxu0  ;;  %v3708_v38 = vadd.f32 %v3693_v48, %v3563_v8 }
 0x44a   : > { %6829 = vst [vmem:[#allocation28_spill] sm:$0xff] %v6617_v50  ;;  %v5469_v58 = vpop.f32.mrf.mxu1  ;;  %v3702_v50 = vadd.f32 %v3663_v0, %v3557_v26  ;;  %v3417_v37 = vadd.f32 %v5419_v34, %v3262_v15  ;;  %v3850_v0 = vadd.f32 %v5458_v25, %v3705_v3 }
 0x44b   : > { %v5483_v35 = vpop.f32.mrf.mxu0  ;;  %v3993_v32 = vadd.f32 %v5469_v58, %v3848_v49 }
 0x44c   : > { %v3953_v52 = vpop.f32.mrf.mxu1  ;;  %v3847_v45 = vadd.f32 %v3808_v23, %v3702_v50  ;;  %v3562_v41 = vadd.f32 %v5433_v27, %v3417_v37  ;;  %v4916_v27 = vld [vmem:[%s6752_s14] ss:$0 sm:$0xff] }
 0x44d   : > { %v4098_v2 = vpop.f32.mrf.mxu0  ;;  %v4138_v30 = vadd.f32 %v5483_v35, %v3993_v32  ;;  %v6830_v47 = vld [vmem:[#allocation26_spill] sm:$0xff] }
 0x44e   : > { %v5472_v62 = vpop.f32.mrf.mxu1  ;;  %v3992_v14 = vadd.f32 %v3953_v52, %v3847_v45  ;;  %v3707_v34 = vadd.f32 %v5447_v10, %v3562_v41  ;;  %v3851_v10 = vadd.f32 %v6830_v47, %v3706_v17 }
 0x44f   : > { %v5486_v6 = vpop.f32.mrf.mxu0  ;;  %v3995_v40 = vadd.f32 %v5472_v62, %v3850_v0  ;;  %v6831_v53 = vld [vmem:[#allocation27_spill] sm:$0xff] }
 0x450   : > { %v3963_v1 = vpop.f32.mrf.mxu1  ;;  %v4137_v39 = vadd.f32 %v4098_v2, %v3992_v14  ;;  %v3852_v42 = vadd.f32 %v6611_v59, %v3707_v34  ;;  %v3854_v58 = vadd.f32 %v6831_v53, %v3709_v5 }
 0x451   : > { %v4108_v9 = vpop.f32.mrf.mxu0  ;;  %v3994_v57 = vadd.f32 %v3963_v1, %v3849_v44  ;;  %v4140_v13 = vadd.f32 %v5486_v6, %v3995_v40  ;;  %v6832_v31 = vld [vmem:[#allocation28_spill] sm:$0xff] }
 0x452   : > { %v5475_v7 = vpop.f32.mrf.mxu1  ;;  %v3853_v2 = vadd.f32 %v6832_v31, %v3708_v38 }
 0x453   : > { %v5489_v18 = vpop.f32.mrf.mxu0  ;;  %v3997_v35 = vadd.f32 %v5475_v7, %v3852_v42  ;;  %v4139_v52 = vadd.f32 %v4108_v9, %v3994_v57 }
 0x454   : > { %v3973_v24 = vpop.f32.mrf.mxu1 }
 0x455   : > { %v4118_v63 = vpop.f32.mrf.mxu0  ;;  %v3996_v46 = vadd.f32 %v3973_v24, %v3851_v10  ;;  %v4142_v6 = vadd.f32 %v5489_v18, %v3997_v35 }
 0x456   : > { %v5478_v54 = vpop.f32.mrf.mxu1 }
 0x457   : > { %v5492_v56 = vpop.f32.mrf.mxu0  ;;  %v3999_v62 = vadd.f32 %v5478_v54, %v3854_v58  ;;  %v4141_v36 = vadd.f32 %v4118_v63, %v3996_v46 }
 0x458   : > { %v3983_v28 = vpop.f32.mrf.mxu1 }
 0x459   : > { %v3998_v37 = vadd.f32 %v3983_v28, %v3853_v2  ;;  %v4128_v7 = vpop.f32.mrf.mxu0  ;;  %v4144_v11 = vadd.f32 %v5492_v56, %v3999_v62 }
 0x45a   : > { %v5497_v23 = vpop.f32.mrf.mxu1 }
 0x45b   : > { %v4283_v25 = vadd.f32 %v5497_v23, %v4138_v30  ;;  %v4143_v9 = vadd.f32 %v4128_v7, %v3998_v37  ;;  %v6833_v37 = vld [vmem:[#allocation16_spill] sm:$0xff]  ;;  %v4935_v7 = vld [vmem:[%s6758_s20] ss:$0 sm:$0xff] }
 0x45c   : > { %v4243_v15 = vpop.f32.mrf.mxu1 }
 0x45d   : > { %v4298_v50 = vmul.f32 %v4916_v27, %v4283_v25  ;;  %v4282_v51 = vadd.f32 %v4243_v15, %v4137_v39 }
 0x45e   : > { %v5500_v55 = vpop.f32.mrf.mxu1 }
 0x45f   : > { %v6630_v59 = vadd.f32 %v4917_v21, %v4298_v50  ;;  %v4297_v60 = vmul.f32 %v4916_v27, %v4282_v51  ;;  %v4285_v48 = vadd.f32 %v5500_v55, %v4140_v13 }
 0x460   : > { %v4253_v26 = vpop.f32.mrf.mxu1 }
 0x461   : > { %v4919_v4 = vmul.f32 -1.442695, %v6630_v59  ;;  %v6634_v33 = vadd.f32 %v4917_v21, %v4297_v60  ;;  %v4300_v29 = vmul.f32 %v4916_v27, %v4285_v48  ;;  %v4284_v1 = vadd.f32 %v4253_v26, %v4139_v52 }
 0x462   : > { %v5503_v43 = vpop.f32.mrf.mxu1 }
 0x463   : > { %5691 = vpow2.f32 %v4919_v4  ;;  %v4918_v61 = vmul.f32 -1.442695, %v6634_v33  ;;  %v6637_v49 = vadd.f32 %v4917_v21, %v4300_v29  ;;  %v4299_v3 = vmul.f32 %v4916_v27, %v4284_v1 }
 0x464   : > { %v4287_v20 = vadd.f32 %v5503_v43, %v4142_v6  ;;  %v4263_v24 = vpop.f32.mrf.mxu1 }
 0x465   : > { %5693 = vpow2.f32 %v4918_v61  ;;  %v4921_v45 = vmul.f32 -1.442695, %v6637_v49  ;;  %v4314_v19 = vadd.f32 %v4917_v21, %v4299_v3  ;;  %v4286_v32 = vadd.f32 %v4263_v24, %v4141_v36  ;;  %v4934_v36 = vld [vmem:[%s6757_s19] ss:$0 sm:$0xff]  ;;  %v6834_v3 = vld [vmem:[#allocation17_spill] sm:$0xff] }
 0x466   : > { %v4302_v41 = vmul.f32 %v4916_v27, %v4287_v20  ;;  %v5506_v12 = vpop.f32.mrf.mxu1 }
 0x467   : > { %5695 = vpow2.f32 %v4921_v45  ;;  %v4920_v22 = vmul.f32 -1.442695, %v4314_v19  ;;  %v4301_v54 = vmul.f32 %v4916_v27, %v4286_v32  ;;  %v4289_v0 = vadd.f32 %v5506_v12, %v4144_v11 }
 0x468   : > { %v4317_v14 = vadd.f32 %v4917_v21, %v4302_v41  ;;  %v4273_v16 = vpop.f32.mrf.mxu1 }
 0x469   : > { %5697 = vpow2.f32 %v4920_v22  ;;  %v4316_v34 = vadd.f32 %v4917_v21, %v4301_v54  ;;  %v4304_v17 = vmul.f32 %v4916_v27, %v4289_v0  ;;  %v4288_v28 = vadd.f32 %v4273_v16, %v4143_v9  ;;  %v6836_v54 = vld [vmem:[#allocation19_spill] sm:$0xff] }
 0x46a   : > { %v4923_v44 = vmul.f32 -1.442695, %v4317_v14 }
 0x46b   : > { %v4922_v30 = vmul.f32 -1.442695, %v4316_v34  ;;  %v4319_v40 = vadd.f32 %v4917_v21, %v4304_v17  ;;  %v4303_v18 = vmul.f32 %v4916_v27, %v4288_v28  ;;  %v6837_v28 = vld [vmem:[#allocation21_spill] sm:$0xff] }
 0x46c   : > { %5699 = vpow2.f32 %v4923_v44 }
 0x46d   : > { %5701 = vpow2.f32 %v4922_v30  ;;  %v4925_v8 = vmul.f32 -1.442695, %v4319_v40  ;;  %v4318_v5 = vadd.f32 %v4917_v21, %v4303_v18 }
 0x46f   : > { %5703 = vpow2.f32 %v4925_v8  ;;  %v4924_v23 = vmul.f32 -1.442695, %v4318_v5  ;;  %v6838_v8 = vld [vmem:[#allocation22_spill] sm:$0xff] }
 0x470   : > { %v5692_v39 = vpop.eup %5691 }
 0x471   : > { %v4345_v57 = vadd.f32 1.0, %v5692_v39  ;;  %5705 = vpow2.f32 %v4924_v23 }
 0x472   : > { %v5694_v25 = vpop.eup %5693 }
 0x473   : > { %v4344_v42 = vadd.f32 1.0, %v5694_v25  ;;  %5707 = vrcp.f32 %v4345_v57 }
 0x474   : > { %v5696_v47 = vpop.eup %5695 }
 0x475   : > { %5709 = vrcp.f32 %v4344_v42  ;;  %v4347_v10 = vadd.f32 1.0, %v5696_v47  ;;  %v6839_v42 = vld [vmem:[#allocation23_spill] sm:$0xff] }
 0x476   : > { %v5698_v38 = vpop.eup %5697 }
 0x477   : > { %v4346_v15 = vadd.f32 1.0, %v5698_v38  ;;  %5711 = vrcp.f32 %v4347_v10 }
 0x479   : > { %v5700_v13 = vpop.eup %5699  ;;  %5713 = vrcp.f32 %v4346_v15 }
 0x47a   : > { %v5702_v27 = vpop.eup %5701  ;;  %v4349_v63 = vadd.f32 1.0, %v5700_v13 }
 0x47b   : > { %v4348_v50 = vadd.f32 1.0, %v5702_v27  ;;  %v6840_v27 = vld [vmem:[#allocation24_spill] sm:$0xff] }
 0x47c   : > { %v5704_v21 = vpop.eup %5703  ;;  %5715 = vrcp.f32 %v4349_v63 }
 0x47d   : > { %5717 = vrcp.f32 %v4348_v50  ;;  %v4351_v51 = vadd.f32 1.0, %v5704_v21 }
 0x47e   : > { %v5706_v53 = vpop.eup %5705 }
 0x47f   : > { %v4350_v58 = vadd.f32 1.0, %v5706_v53  ;;  %5719 = vrcp.f32 %v4351_v51 }
 0x480   : > { %v5708_v35 = vpop.eup %5707 }
 0x481   : > { %5721 = vrcp.f32 %v4350_v58  ;;  %v4369_v52 = vmul.f32 %v5708_v35, %v6630_v59 }
 0x482   : > { %v5710_v46 = vpop.eup %5709 }
 0x483   : > { %v4368_v55 = vmul.f32 %v5710_v46, %v6634_v33 }
 0x484   : > { %v5712_v56 = vpop.eup %5711 }
 0x485   : > { %5509 = vmatprep.mubr.msk.f32.mxu0 %vm655_vm3, %v4368_v55  ;;  %v4371_v31 = vmul.f32 %v5712_v56, %v6637_v49 }
 0x486   : > { %v5714_v60 = vpop.eup %5713  ;;  %5510 = vmatmul.mubr.msk.f32.vlgmr.msra.gmra.mxu0 %vm655_vm3, %v4369_v52 }
 0x487   : > { %v4370_v48 = vmul.f32 %v5714_v60, %v4314_v19  ;;  %v6835_v19 = vld [vmem:[#allocation18_spill] sm:$0xff] }
 0x489   : > { %v5716_v2 = vpop.eup %5715  ;;  %5512 = vmatprep.mubr.msk.f32.mxu0 %vm655_vm3, %v4370_v48 }
 0x48a   : > { %v5718_v62 = vpop.eup %5717  ;;  %5513 = vmatmul.mubr.msk.f32.gmra.mxu0 %vm655_vm3, %v4371_v31  ;;  %v4373_v4 = vmul.f32 %v5716_v2, %v4317_v14 }
 0x48b   : > { %v4372_v26 = vmul.f32 %v5718_v62, %v4316_v34 }
 0x48c   : > { %v5720_v33 = vpop.eup %5719 }
 0x48d   : > { %5515 = vmatprep.mubr.msk.f32.mxu0 %vm655_vm3, %v4372_v26  ;;  %v4375_v1 = vmul.f32 %v5720_v33, %v4319_v40 }
 0x48e   : > { %v5722_v59 = vpop.eup %5721  ;;  %5516 = vmatmul.mubr.msk.f32.gmra.mxu0 %vm655_vm3, %v4373_v4 }
 0x48f   : > { %v4374_v29 = vmul.f32 %v5722_v59, %v4318_v5 }
 0x491   : > { %5518 = vmatprep.mubr.msk.f32.mxu0 %vm655_vm3, %v4374_v29 }
 0x492   : > { %5519 = vmatmul.mubr.msk.f32.gmra.mxu0 %vm655_vm3, %v4375_v1 }
 0x546   : > { %v5511_v6 = vpop.f32.mrf.mxu0 }
 0x547   : > { %v4507_v43 = vadd.f32 %v5511_v6, %v6833_v37 }
 0x548   : > { %v4467_v61 = vpop.f32.mrf.mxu0 }
 0x549   : > { %v4522_v49 = vmul.f32 %v4934_v36, %v4507_v43  ;;  %v4506_v11 = vadd.f32 %v4467_v61, %v6834_v3 }
 0x54a   : > { %v5514_v20 = vpop.f32.mrf.mxu0 }
 0x54b   : > { %v6659_v24 = vadd.f32 %v4935_v7, %v4522_v49  ;;  %v4521_v45 = vmul.f32 %v4934_v36, %v4506_v11  ;;  %v4509_v32 = vadd.f32 %v5514_v20, %v6835_v19 }
 0x54c   : > { %v4477_v9 = vpop.f32.mrf.mxu0 }
 0x54d   : > { %v4937_v41 = vmul.f32 -1.442695, %v6659_v24  ;;  %v6663_v12 = vadd.f32 %v4935_v7, %v4521_v45  ;;  %v4524_v22 = vmul.f32 %v4934_v36, %v4509_v32  ;;  %v4508_v0 = vadd.f32 %v4477_v9, %v6836_v54 }
 0x54e   : > { %v5517_v14 = vpop.f32.mrf.mxu0 }
 0x54f   : > { %5723 = vpow2.f32 %v4937_v41  ;;  %v4936_v16 = vmul.f32 -1.442695, %v6663_v12  ;;  %v6667_v34 = vadd.f32 %v4935_v7, %v4524_v22  ;;  %v4523_v17 = vmul.f32 %v4934_v36, %v4508_v0 }
 0x550   : > { %v4511_v44 = vadd.f32 %v5517_v14, %v6837_v28  ;;  %v4487_v30 = vpop.f32.mrf.mxu0 }
 0x551   : > { %5725 = vpow2.f32 %v4936_v16  ;;  %v4939_v40 = vmul.f32 -1.442695, %v6667_v34  ;;  %v4538_v18 = vadd.f32 %v4935_v7, %v4523_v17  ;;  %v4510_v5 = vadd.f32 %v4487_v30, %v6838_v8 }
 0x552   : > { %v4526_v23 = vmul.f32 %v4934_v36, %v4511_v44  ;;  %v5520_v39 = vpop.f32.mrf.mxu0 }
 0x553   : > { %5727 = vpow2.f32 %v4939_v40  ;;  %v4938_v57 = vmul.f32 -1.442695, %v4538_v18  ;;  %v4525_v25 = vmul.f32 %v4934_v36, %v4510_v5  ;;  %v4513_v47 = vadd.f32 %v5520_v39, %v6839_v42 }
 0x554   : > { %v4541_v10 = vadd.f32 %v4935_v7, %v4526_v23  ;;  %v4497_v38 = vpop.f32.mrf.mxu0 }
 0x555   : > { %5729 = vpow2.f32 %v4938_v57  ;;  %v4540_v15 = vadd.f32 %v4935_v7, %v4525_v25  ;;  %v4528_v13 = vmul.f32 %v4934_v36, %v4513_v47  ;;  %v4512_v63 = vadd.f32 %v4497_v38, %v6840_v27 }
 0x556   : > { %v4941_v50 = vmul.f32 -1.442695, %v4541_v10 }
 0x557   : > { %v4940_v21 = vmul.f32 -1.442695, %v4540_v15  ;;  %v4543_v51 = vadd.f32 %v4935_v7, %v4528_v13  ;;  %v4527_v53 = vmul.f32 %v4934_v36, %v4512_v63 }
 0x558   : > { %5731 = vpow2.f32 %v4941_v50 }
 0x559   : > { %5733 = vpow2.f32 %v4940_v21  ;;  %v4943_v58 = vmul.f32 -1.442695, %v4543_v51  ;;  %v4542_v35 = vadd.f32 %v4935_v7, %v4527_v53 }
 0x55b   : > { %5735 = vpow2.f32 %v4943_v58  ;;  %v4942_v46 = vmul.f32 -1.442695, %v4542_v35 }
 0x55c   : > { %v5724_v55 = vpop.eup %5723 }
 0x55d   : > { %v4569_v52 = vadd.f32 1.0, %v5724_v55  ;;  %5737 = vpow2.f32 %v4942_v46 }
 0x55e   : > { %v5726_v56 = vpop.eup %5725 }
 0x55f   : > { %5739 = vrcp.f32 %v4569_v52  ;;  %v4568_v60 = vadd.f32 1.0, %v5726_v56 }
 0x560   : > { %v5728_v48 = vpop.eup %5727 }
 0x561   : > { %5741 = vrcp.f32 %v4568_v60  ;;  %v4571_v31 = vadd.f32 1.0, %v5728_v48 }
 0x562   : > { %v5730_v2 = vpop.eup %5729 }
 0x563   : > { %5743 = vrcp.f32 %v4571_v31  ;;  %v4570_v62 = vadd.f32 1.0, %v5730_v2 }
 0x565   : > { %v5732_v26 = vpop.eup %5731  ;;  %5745 = vrcp.f32 %v4570_v62 }
 0x566   : > { %v5734_v4 = vpop.eup %5733  ;;  %v4573_v33 = vadd.f32 1.0, %v5732_v26 }
 0x567   : > { %v4572_v59 = vadd.f32 1.0, %v5734_v4 }
 0x568   : > { %v5736_v29 = vpop.eup %5735  ;;  %5747 = vrcp.f32 %v4573_v33 }
 0x569   : > { %5749 = vrcp.f32 %v4572_v59  ;;  %v4575_v1 = vadd.f32 1.0, %v5736_v29 }
 0x56a   : > { %v5738_v6 = vpop.eup %5737 }
 0x56b   : > { %5751 = vrcp.f32 %v4575_v1  ;;  %v4574_v36 = vadd.f32 1.0, %v5738_v6 }
 0x56c   : > { %v5740_v37 = vpop.eup %5739 }
 0x56d   : > { %v4593_v43 = vmul.f32 %v5740_v37, %v6659_v24  ;;  %5753 = vrcp.f32 %v4574_v36 }
 0x56e   : > { %v5742_v7 = vpop.eup %5741 }
 0x56f   : > { %4601 = vst.msk [vmem:[%s649_s30 + $0x8] sm:$0xff] %vm921_vm2, %v4593_v43  ;;  %v4592_v61 = vmul.f32 %v5742_v7, %v6663_v12 }
 0x570   : > { %v5744_v49 = vpop.eup %5743 }
 0x571   : > { %4600 = vst.msk [vmem:[%s649_s30] sm:$0xff] %vm921_vm2, %v4592_v61  ;;  %v4595_v3 = vmul.f32 %v5744_v49, %v6667_v34 }
 0x572   : > { %v5746_v11 = vpop.eup %5745 }
 0x573   : > { %4603 = vst.msk [vmem:[%s649_s30 + $0x18] sm:$0xff] %vm921_vm2, %v4595_v3  ;;  %v4594_v20 = vmul.f32 %v5746_v11, %v4538_v18 }
 0x575   : > { %v5748_v45 = vpop.eup %5747  ;;  %4602 = vst.msk [vmem:[%s649_s30 + $0x10] sm:$0xff] %vm921_vm2, %v4594_v20 }
 0x576   : > { %v5750_v24 = vpop.eup %5749  ;;  %v4597_v19 = vmul.f32 %v5748_v45, %v4541_v10 }
 0x577   : > { %v4596_v32 = vmul.f32 %v5750_v24, %v4540_v15 }
 0x578   : > { %v5752_v9 = vpop.eup %5751  ;;  %4605 = vst.msk [vmem:[%s649_s30 + $0x28] sm:$0xff] %vm921_vm2, %v4597_v19 }
 0x579   : > { %4604 = vst.msk [vmem:[%s649_s30 + $0x20] sm:$0xff] %vm921_vm2, %v4596_v32  ;;  %v4599_v41 = vmul.f32 %v5752_v9, %v4543_v51 }
 0x57a   : > { %v5754_v12 = vpop.eup %5753 }
 0x57b   : > { %4607 = vst.msk [vmem:[%s649_s30 + $0x38] sm:$0xff] %vm921_vm2, %v4599_v41  ;;  %v4598_v22 = vmul.f32 %v5754_v12, %v4542_v35 }
 0x57d   : > { %4606 = vst.msk [vmem:[%s649_s30 + $0x30] sm:$0xff] %vm921_vm2, %v4598_v22 }
 0x57e   : > { %5768 = shalt.err (!%p5765_p3)
}
 0x57f   : > { %s5769_s26 = scalar_lea.hbm %s6690_s28, 1024  ;;  %s5773_s2 = scalar_lea.hbm %s6841_s1, 2048 }
 0x580   : > { %p5770_p4 = scmp.ne.s32.totalorder %s6690_s28, %s5769_s26  ;;  %p5774_p9 = scmp.lt.s32.totalorder %s6690_s28, %s6841_s1 }
 0x581   : > { %p5775_p10 = scmp.lt.s32.totalorder %s5773_s2, %s5769_s26 }
 0x582   : > { %p5771_p7 = pnand %p5770_p4, %p5969_p5 }
 0x583   : > { %p5776_p11 = por %p5775_p10, %p5774_p9 }
 0x584   : > { %p5772_p8 = pneg %p5771_p7 }
 0x586   : > { %p5777_p12 = pnand %p5776_p11, %p5772_p8 }
 0x588   : > { %5780 = shalt.err (!%p5777_p12)
}
 0x589   : > { %s5819_s0 = smov 128   ;;  %s5820_s27 = smov 8  }
 0x58a   : > { %5521 = dma.vmem_to_hbm [thread:$0]  (%p5969_p5), %s6692_s4, 1024, %s6690_s28, %s6698_s3, %s5819_s0, %s5819_s0, %s5820_s27  }
 0x58b PF: > { %s6842_s22 = sld [smem:[#allocation8_spill]] }
 0x58c   : > { %s6843_s30 = sld [smem:[#allocation6_spill]] }
 0x591   : > { %p5527_p13 = scmp.ge.s32.totalorder %s6842_s22, 2 }
 0x592   : > { %s4637_s7 = sand.u32 1, %s6843_s30  }
 0x593   : > { %p5524_p0 = pnand %p5527_p13, %p5973_p6  ;;  %s4638_s6 = scalar_lea.sflag [#allocation4], %s4637_s7 }
 0x595   : > { %p5525_p1 = pneg %p5524_p0 }
 0x597   : > { %5798 = dma.done.wait (%p5525_p1), %s4638_s6, 1024  }
 0x598   : > { %5800 = vsyncadd (%p5525_p1), %s4638_s6, 4294966272  ;;  %s6845_s27 = sld [smem:[#allocation9_spill]]  ;;  %s6848_s2 = smov %s5807_s25 }
 0x599   : > { %s6846_s26 = sld [smem:[#allocation7_spill]] }
 0x59a   : > { %s6847_s21 = sld [smem:[#allocation10_spill]] }
 0x59e   : > { %p31_p2 = scmp.ge.s32.totalorder %s6845_s27, 4  }
 0x59f   : > { %s6849_s25 = smov %s6846_s26 }
 0x5a0   : > { %s6850_s26 = smov %s6847_s21  ;;  %33 = sbr.rel (!%p31_p2) target bundleno = 13 (0xd), region = 141 }
 0x5a5   :  { %4643 = vsyncpa [#allocation4], 1 }
 0x5a6   :  { %4645 = vsyncpa [#allocation4 + $0x1], 1 }

</bundles_post_ra>
